<compile_context>
chip_gen: v7x
topology: tpu7x:2x2x1
jax: 0.10.0
libtpu: 0.0.40
codegen_flags: <defaults>
</compile_context>

<pallas_src>
import math
from functools import partial

import jax
import jax.numpy as jnp
from jax import lax
from jax.experimental import pallas as pl
from jax.experimental.pallas import tpu as pltpu


def _psconv_kernel(x_ref, w_ref, b_ref, o_ref, *, H, W, ker, cout_total):
    """Fused im2col + conv matmul + bias for one image.

    x_ref : (1, H+2p, W+2p, Cin_pad)      bf16  padded NHWC image (VMEM)
    w_ref : (ker*ker, Cin_pad, Cout_pad)  bf16  per-tap weight slabs
    b_ref : (1, Cout_pad)                 f32
    o_ref : (1, Cout_total, H*W)          f32   flattened NCHW conv output
    """
    acc = None
    for dy in range(ker):
        for dx in range(ker):
            t = dy * ker + dx
            # (H, W, Cin_pad) tap window.  Collapsing (H, W) keeps the minor
            # (lane) dim, so the reshape is layout-trivial, not a relayout.
            x_tap = x_ref[0, dy:dy + H, dx:dx + W, :].reshape(H * W, -1)
            part = jnp.dot(x_tap, w_ref[t], preferred_element_type=jnp.float32)
            acc = part if acc is None else acc + part
    acc = acc + b_ref[...]                       # f32 bias / epilogue (v5e-safe)
    # (H*W, Cout_pad) -> (Cout_pad, H*W): both dims are (8,128)-aligned, so this
    # is a native-tiled transpose; then slice off the channel padding.
    acc_t = jnp.transpose(acc, (1, 0))
    o_ref[0] = acc_t[:cout_total, :].astype(o_ref.dtype)


def psconv_block_forward(x_nchw, weight_oihw, bias, scale, ker):
    """Forward pass of Psconv_block (matches the PyTorch module).

    x_nchw      : (N, Cin, H, W)                  f32
    weight_oihw : (Cout*scale^2, Cin, ker, ker)   f32
    bias        : (Cout*scale^2,)                 f32
    returns     : (N, Cout, H*scale, W*scale)     f32
    """
    N, Cin, H, W = x_nchw.shape
    cout_total = weight_oihw.shape[0]
    assert cout_total % (scale * scale) == 0
    cout = cout_total // (scale * scale)
    pad = ker // 2
    Hp, Wp = H + 2 * pad, W + 2 * pad
    HW = H * W

    # Padding: Cin -> multiple of 8 (friendly matmul K), Cout -> multiple of 128
    # so the accumulator transposes natively and stores lane-dense.
    cin_p = -(-Cin // 8) * 8
    cout_p = -(-cout_total // 128) * 128

    # ---- input prep: NCHW -> padded NHWC, bf16 (halves HBM read traffic) ----
    x_nhwc = jnp.transpose(x_nchw, (0, 2, 3, 1))
    xp = jnp.pad(x_nhwc, ((0, 0), (pad, pad), (pad, pad), (0, cin_p - Cin)))
    xp = xp.astype(jnp.bfloat16)

    # ---- weight prep: (O, I, kh, kw) -> (kh*kw, I_pad, O_pad), bf16 ----
    w_taps = jnp.transpose(weight_oihw, (2, 3, 1, 0)).reshape(ker * ker, Cin, cout_total)
    w_taps = jnp.pad(w_taps, ((0, 0), (0, cin_p - Cin), (0, cout_p - cout_total)))
    w_taps = w_taps.astype(jnp.bfloat16)
    b_mat = jnp.pad(bias, (0, cout_p - cout_total)).reshape(1, cout_p).astype(jnp.float32)

    # TODO(synk): for large images / large Cin, tile H with a halo'd block and a
    # lane-flattened input layout instead of whole-image blocks (fine at these sizes).

    flops = 2 * N * HW * (ker * ker * cin_p) * cout_p
    bytes_accessed = (N * Hp * Wp * cin_p * 2           # bf16 input (read once)
                      + ker * ker * cin_p * cout_p * 2  # bf16 weights
                      + cout_p * 4                      # f32 bias
                      + N * cout_total * HW * 4)        # f32 conv output

    conv_flat = pl.pallas_call(
        partial(_psconv_kernel, H=H, W=W, ker=ker, cout_total=cout_total),
        out_shape=jax.ShapeDtypeStruct((N, cout_total, HW), jnp.float32),
        grid=(N,),
        in_specs=[
            pl.BlockSpec((1, Hp, Wp, cin_p), lambda n: (n, 0, 0, 0)),
            pl.BlockSpec((ker * ker, cin_p, cout_p), lambda n: (0, 0, 0)),
            pl.BlockSpec((1, cout_p), lambda n: (0, 0)),
        ],
        out_specs=pl.BlockSpec((1, cout_total, HW), lambda n: (n, 0, 0)),
        compiler_params=pltpu.CompilerParams(
            dimension_semantics=("parallel",),
            vmem_limit_bytes=32 * 1024 * 1024),
        cost_estimate=pl.CostEstimate(flops=flops, transcendentals=0,
                                      bytes_accessed=bytes_accessed),
    )(xp, w_taps, b_mat)

    # ---- PixelShuffle(scale), PyTorch semantics, on the flat NCHW conv out ----
    y = conv_flat.reshape(N, cout, scale, scale, H, W)
    y = jnp.transpose(y, (0, 1, 4, 2, 5, 3))
    return y.reshape(N, cout, H * scale, W * scale)


def _reference_forward(x_nchw, weight_oihw, bias, scale, ker):
    """Pure-JAX reference (lax conv on the same bf16-rounded operands, f32 acc)."""
    pad = ker // 2
    conv = lax.conv_general_dilated(
        x_nchw.astype(jnp.bfloat16), weight_oihw.astype(jnp.bfloat16),
        window_strides=(1, 1), padding=[(pad, pad), (pad, pad)],
        dimension_numbers=("NCHW", "OIHW", "NCHW"),
        preferred_element_type=jnp.float32,
    ) + bias.reshape(1, -1, 1, 1)
    N, Ct, H, W = conv.shape
    cout = Ct // (scale * scale)
    y = conv.reshape(N, cout, scale, scale, H, W)
    y = jnp.transpose(y, (0, 1, 4, 2, 5, 3))
    return y.reshape(N, cout, H * scale, W * scale)


if __name__ == "__main__":
    # Module config consistent with Psconv_block(scale, cin, cout, ker).
    scale, cin, cout, ker = 2, 4, 4, 3
    N, H, W = 2, 16, 16
    cout_total = cout * scale ** 2

    key = jax.random.PRNGKey(0)
    kx, kw = jax.random.split(key)

    x = jax.random.normal(kx, (N, cin, H, W), dtype=jnp.float32)
    # Init matching the PyTorch module: weight ~ N(0, sqrt(2/(cout_total*ker*ker))), bias = 0.
    std = math.sqrt(2.0 / (cout_total * ker * ker))
    weight = std * jax.random.normal(kw, (cout_total, cin, ker, ker), dtype=jnp.float32)
    bias = jnp.zeros((cout_total,), dtype=jnp.float32)

    y = psconv_block_forward(x, weight, bias, scale, ker)
    y = jax.block_until_ready(y)

    y_ref = _reference_forward(x, weight, bias, scale, ker)
    assert y.shape == (N, cout, H * scale, W * scale)
    assert jnp.allclose(y, y_ref, atol=5e-3, rtol=5e-3), \
        float(jnp.max(jnp.abs(y - y_ref)))

    print("KERNEL_OK")
</pallas_src>

<mosaic_0001>
module attributes {stable_mosaic.version = 11 : i64} {
  func.func @_psconv_kernel(%arg0: i32, %arg1: memref<1x18x18x8xbf16, #tpu.memory_space<vmem>>, %arg2: memref<9x8x128xbf16, #tpu.memory_space<vmem>>, %arg3: memref<1x128xf32, #tpu.memory_space<vmem>>, %arg4: memref<1x16x256xf32, #tpu.memory_space<vmem>>) attributes {dimension_semantics = [#tpu.dimension_semantics<parallel>], iteration_bounds = array<i64: 2>, scalar_prefetch = 0 : i64, scratch_operands = 0 : i64, tpu.core_type = #tpu.core_type<tc>, window_params = [{transform_indices = @transform_0, window_bounds = array<i64: 1, 18, 18, 8>}, {pipeline_mode = #tpu.pipeline_mode<synchronous>, transform_indices = @transform_1, window_bounds = array<i64: 9, 8, 128>}, {pipeline_mode = #tpu.pipeline_mode<synchronous>, transform_indices = @transform_2, window_bounds = array<i64: 1, 128>}, {transform_indices = @transform_3, window_bounds = array<i64: 1, 16, 256>}]} {
    %c0 = arith.constant 0 : index
    %c0_0 = arith.constant 0 : index
    %c0_1 = arith.constant 0 : index
    %c0_2 = arith.constant 0 : index
    %0 = vector.load %arg1[%c0, %c0_0, %c0_1, %c0_2] : memref<1x18x18x8xbf16, #tpu.memory_space<vmem>>, vector<1x16x16x8xbf16>
    %1 = vector.shape_cast %0 : vector<1x16x16x8xbf16> to vector<16x16x8xbf16>
    %2 = vector.shape_cast %1 : vector<16x16x8xbf16> to vector<256x8xbf16>
    %c0_3 = arith.constant 0 : index
    %c0_4 = arith.constant 0 : index
    %c0_5 = arith.constant 0 : index
    %3 = vector.load %arg2[%c0_3, %c0_4, %c0_5] : memref<9x8x128xbf16, #tpu.memory_space<vmem>>, vector<1x8x128xbf16>
    %4 = vector.shape_cast %3 : vector<1x8x128xbf16> to vector<8x128xbf16>
    %cst = arith.constant dense<0.000000e+00> : vector<256x128xf32>
    %5 = tpu.matmul %2, %4, %cst {dimension_numbers = #tpu.dot_dimension_numbers<[1], [0], [0], [1], [0, 0, 1, 1], [], []>} : vector<256x8xbf16>, vector<8x128xbf16>, vector<256x128xf32> -> vector<256x128xf32>
    %c0_6 = arith.constant 0 : index
    %c0_7 = arith.constant 0 : index
    %c1 = arith.constant 1 : index
    %c0_8 = arith.constant 0 : index
    %6 = vector.load %arg1[%c0_6, %c0_7, %c1, %c0_8] : memref<1x18x18x8xbf16, #tpu.memory_space<vmem>>, vector<1x16x16x8xbf16>
    %7 = vector.shape_cast %6 : vector<1x16x16x8xbf16> to vector<16x16x8xbf16>
    %8 = vector.shape_cast %7 : vector<16x16x8xbf16> to vector<256x8xbf16>
    %c1_9 = arith.constant 1 : index
    %c0_10 = arith.constant 0 : index
    %c0_11 = arith.constant 0 : index
    %9 = vector.load %arg2[%c1_9, %c0_10, %c0_11] : memref<9x8x128xbf16, #tpu.memory_space<vmem>>, vector<1x8x128xbf16>
    %10 = vector.shape_cast %9 : vector<1x8x128xbf16> to vector<8x128xbf16>
    %cst_12 = arith.constant dense<0.000000e+00> : vector<256x128xf32>
    %11 = tpu.matmul %8, %10, %cst_12 {dimension_numbers = #tpu.dot_dimension_numbers<[1], [0], [0], [1], [0, 0, 1, 1], [], []>} : vector<256x8xbf16>, vector<8x128xbf16>, vector<256x128xf32> -> vector<256x128xf32>
    %12 = arith.addf %5, %11 : vector<256x128xf32>
    %c0_13 = arith.constant 0 : index
    %c0_14 = arith.constant 0 : index
    %c2 = arith.constant 2 : index
    %c0_15 = arith.constant 0 : index
    %13 = vector.load %arg1[%c0_13, %c0_14, %c2, %c0_15] : memref<1x18x18x8xbf16, #tpu.memory_space<vmem>>, vector<1x16x16x8xbf16>
    %14 = vector.shape_cast %13 : vector<1x16x16x8xbf16> to vector<16x16x8xbf16>
    %15 = vector.shape_cast %14 : vector<16x16x8xbf16> to vector<256x8xbf16>
    %c2_16 = arith.constant 2 : index
    %c0_17 = arith.constant 0 : index
    %c0_18 = arith.constant 0 : index
    %16 = vector.load %arg2[%c2_16, %c0_17, %c0_18] : memref<9x8x128xbf16, #tpu.memory_space<vmem>>, vector<1x8x128xbf16>
    %17 = vector.shape_cast %16 : vector<1x8x128xbf16> to vector<8x128xbf16>
    %cst_19 = arith.constant dense<0.000000e+00> : vector<256x128xf32>
    %18 = tpu.matmul %15, %17, %cst_19 {dimension_numbers = #tpu.dot_dimension_numbers<[1], [0], [0], [1], [0, 0, 1, 1], [], []>} : vector<256x8xbf16>, vector<8x128xbf16>, vector<256x128xf32> -> vector<256x128xf32>
    %19 = arith.addf %12, %18 : vector<256x128xf32>
    %c0_20 = arith.constant 0 : index
    %c1_21 = arith.constant 1 : index
    %c0_22 = arith.constant 0 : index
    %c0_23 = arith.constant 0 : index
    %20 = vector.load %arg1[%c0_20, %c1_21, %c0_22, %c0_23] : memref<1x18x18x8xbf16, #tpu.memory_space<vmem>>, vector<1x16x16x8xbf16>
    %21 = vector.shape_cast %20 : vector<1x16x16x8xbf16> to vector<16x16x8xbf16>
    %22 = vector.shape_cast %21 : vector<16x16x8xbf16> to vector<256x8xbf16>
    %c3 = arith.constant 3 : index
    %c0_24 = arith.constant 0 : index
    %c0_25 = arith.constant 0 : index
    %23 = vector.load %arg2[%c3, %c0_24, %c0_25] : memref<9x8x128xbf16, #tpu.memory_space<vmem>>, vector<1x8x128xbf16>
    %24 = vector.shape_cast %23 : vector<1x8x128xbf16> to vector<8x128xbf16>
    %cst_26 = arith.constant dense<0.000000e+00> : vector<256x128xf32>
    %25 = tpu.matmul %22, %24, %cst_26 {dimension_numbers = #tpu.dot_dimension_numbers<[1], [0], [0], [1], [0, 0, 1, 1], [], []>} : vector<256x8xbf16>, vector<8x128xbf16>, vector<256x128xf32> -> vector<256x128xf32>
    %26 = arith.addf %19, %25 : vector<256x128xf32>
    %c0_27 = arith.constant 0 : index
    %c1_28 = arith.constant 1 : index
    %c1_29 = arith.constant 1 : index
    %c0_30 = arith.constant 0 : index
    %27 = vector.load %arg1[%c0_27, %c1_28, %c1_29, %c0_30] : memref<1x18x18x8xbf16, #tpu.memory_space<vmem>>, vector<1x16x16x8xbf16>
    %28 = vector.shape_cast %27 : vector<1x16x16x8xbf16> to vector<16x16x8xbf16>
    %29 = vector.shape_cast %28 : vector<16x16x8xbf16> to vector<256x8xbf16>
    %c4 = arith.constant 4 : index
    %c0_31 = arith.constant 0 : index
    %c0_32 = arith.constant 0 : index
    %30 = vector.load %arg2[%c4, %c0_31, %c0_32] : memref<9x8x128xbf16, #tpu.memory_space<vmem>>, vector<1x8x128xbf16>
    %31 = vector.shape_cast %30 : vector<1x8x128xbf16> to vector<8x128xbf16>
    %cst_33 = arith.constant dense<0.000000e+00> : vector<256x128xf32>
    %32 = tpu.matmul %29, %31, %cst_33 {dimension_numbers = #tpu.dot_dimension_numbers<[1], [0], [0], [1], [0, 0, 1, 1], [], []>} : vector<256x8xbf16>, vector<8x128xbf16>, vector<256x128xf32> -> vector<256x128xf32>
    %33 = arith.addf %26, %32 : vector<256x128xf32>
    %c0_34 = arith.constant 0 : index
    %c1_35 = arith.constant 1 : index
    %c2_36 = arith.constant 2 : index
    %c0_37 = arith.constant 0 : index
    %34 = vector.load %arg1[%c0_34, %c1_35, %c2_36, %c0_37] : memref<1x18x18x8xbf16, #tpu.memory_space<vmem>>, vector<1x16x16x8xbf16>
    %35 = vector.shape_cast %34 : vector<1x16x16x8xbf16> to vector<16x16x8xbf16>
    %36 = vector.shape_cast %35 : vector<16x16x8xbf16> to vector<256x8xbf16>
    %c5 = arith.constant 5 : index
    %c0_38 = arith.constant 0 : index
    %c0_39 = arith.constant 0 : index
    %37 = vector.load %arg2[%c5, %c0_38, %c0_39] : memref<9x8x128xbf16, #tpu.memory_space<vmem>>, vector<1x8x128xbf16>
    %38 = vector.shape_cast %37 : vector<1x8x128xbf16> to vector<8x128xbf16>
    %cst_40 = arith.constant dense<0.000000e+00> : vector<256x128xf32>
    %39 = tpu.matmul %36, %38, %cst_40 {dimension_numbers = #tpu.dot_dimension_numbers<[1], [0], [0], [1], [0, 0, 1, 1], [], []>} : vector<256x8xbf16>, vector<8x128xbf16>, vector<256x128xf32> -> vector<256x128xf32>
    %40 = arith.addf %33, %39 : vector<256x128xf32>
    %c0_41 = arith.constant 0 : index
    %c2_42 = arith.constant 2 : index
    %c0_43 = arith.constant 0 : index
    %c0_44 = arith.constant 0 : index
    %41 = vector.load %arg1[%c0_41, %c2_42, %c0_43, %c0_44] : memref<1x18x18x8xbf16, #tpu.memory_space<vmem>>, vector<1x16x16x8xbf16>
    %42 = vector.shape_cast %41 : vector<1x16x16x8xbf16> to vector<16x16x8xbf16>
    %43 = vector.shape_cast %42 : vector<16x16x8xbf16> to vector<256x8xbf16>
    %c6 = arith.constant 6 : index
    %c0_45 = arith.constant 0 : index
    %c0_46 = arith.constant 0 : index
    %44 = vector.load %arg2[%c6, %c0_45, %c0_46] : memref<9x8x128xbf16, #tpu.memory_space<vmem>>, vector<1x8x128xbf16>
    %45 = vector.shape_cast %44 : vector<1x8x128xbf16> to vector<8x128xbf16>
    %cst_47 = arith.constant dense<0.000000e+00> : vector<256x128xf32>
    %46 = tpu.matmul %43, %45, %cst_47 {dimension_numbers = #tpu.dot_dimension_numbers<[1], [0], [0], [1], [0, 0, 1, 1], [], []>} : vector<256x8xbf16>, vector<8x128xbf16>, vector<256x128xf32> -> vector<256x128xf32>
    %47 = arith.addf %40, %46 : vector<256x128xf32>
    %c0_48 = arith.constant 0 : index
    %c2_49 = arith.constant 2 : index
    %c1_50 = arith.constant 1 : index
    %c0_51 = arith.constant 0 : index
    %48 = vector.load %arg1[%c0_48, %c2_49, %c1_50, %c0_51] : memref<1x18x18x8xbf16, #tpu.memory_space<vmem>>, vector<1x16x16x8xbf16>
    %49 = vector.shape_cast %48 : vector<1x16x16x8xbf16> to vector<16x16x8xbf16>
    %50 = vector.shape_cast %49 : vector<16x16x8xbf16> to vector<256x8xbf16>
    %c7 = arith.constant 7 : index
    %c0_52 = arith.constant 0 : index
    %c0_53 = arith.constant 0 : index
    %51 = vector.load %arg2[%c7, %c0_52, %c0_53] : memref<9x8x128xbf16, #tpu.memory_space<vmem>>, vector<1x8x128xbf16>
    %52 = vector.shape_cast %51 : vector<1x8x128xbf16> to vector<8x128xbf16>
    %cst_54 = arith.constant dense<0.000000e+00> : vector<256x128xf32>
    %53 = tpu.matmul %50, %52, %cst_54 {dimension_numbers = #tpu.dot_dimension_numbers<[1], [0], [0], [1], [0, 0, 1, 1], [], []>} : vector<256x8xbf16>, vector<8x128xbf16>, vector<256x128xf32> -> vector<256x128xf32>
    %54 = arith.addf %47, %53 : vector<256x128xf32>
    %c0_55 = arith.constant 0 : index
    %c2_56 = arith.constant 2 : index
    %c2_57 = arith.constant 2 : index
    %c0_58 = arith.constant 0 : index
    %55 = vector.load %arg1[%c0_55, %c2_56, %c2_57, %c0_58] : memref<1x18x18x8xbf16, #tpu.memory_space<vmem>>, vector<1x16x16x8xbf16>
    %56 = vector.shape_cast %55 : vector<1x16x16x8xbf16> to vector<16x16x8xbf16>
    %57 = vector.shape_cast %56 : vector<16x16x8xbf16> to vector<256x8xbf16>
    %c8 = arith.constant 8 : index
    %c0_59 = arith.constant 0 : index
    %c0_60 = arith.constant 0 : index
    %58 = vector.load %arg2[%c8, %c0_59, %c0_60] : memref<9x8x128xbf16, #tpu.memory_space<vmem>>, vector<1x8x128xbf16>
    %59 = vector.shape_cast %58 : vector<1x8x128xbf16> to vector<8x128xbf16>
    %cst_61 = arith.constant dense<0.000000e+00> : vector<256x128xf32>
    %60 = tpu.matmul %57, %59, %cst_61 {dimension_numbers = #tpu.dot_dimension_numbers<[1], [0], [0], [1], [0, 0, 1, 1], [], []>} : vector<256x8xbf16>, vector<8x128xbf16>, vector<256x128xf32> -> vector<256x128xf32>
    %61 = arith.addf %54, %60 : vector<256x128xf32>
    %c0_62 = arith.constant 0 : index
    %c0_63 = arith.constant 0 : index
    %62 = vector.load %arg3[%c0_62, %c0_63] : memref<1x128xf32, #tpu.memory_space<vmem>>, vector<1x128xf32>
    %63 = vector.broadcast %62 : vector<1x128xf32> to vector<256x128xf32>
    %64 = arith.addf %61, %63 : vector<256x128xf32>
    %65 = tpu.transpose %64, [1, 0] : vector<256x128xf32> -> vector<128x256xf32>
    %66 = vector.extract_strided_slice %65 {offsets = [0, 0], sizes = [16, 256], strides = [1, 1]} : vector<128x256xf32> to vector<16x256xf32>
    %c0_64 = arith.constant 0 : index
    %c0_65 = arith.constant 0 : index
    %c0_66 = arith.constant 0 : index
    %67 = vector.load %arg4[%c0_64, %c0_65, %c0_66] : memref<1x16x256xf32, #tpu.memory_space<vmem>>, vector<1x16x256xf32>
    %68 = vector.shape_cast %67 : vector<1x16x256xf32> to vector<16x256xf32>
    %69 = vector.shape_cast %66 : vector<16x256xf32> to vector<1x16x256xf32>
    tpu.vector_store %arg4[%c0_64, %c0_65, %c0_66], %69 {strides = array<i32>} : memref<1x16x256xf32, #tpu.memory_space<vmem>>, vector<1x16x256xf32>,
    return
  }
  func.func @transform_0(%arg0: i32) -> (i32, i32, i32, i32) {
    %c0_i32 = arith.constant 0 : i32
    %c0_i32_0 = arith.constant 0 : i32
    %c0_i32_1 = arith.constant 0 : i32
    %c0_i32_2 = arith.constant 0 : i32
    return %arg0, %c0_i32, %c0_i32_0, %c0_i32_1 : i32, i32, i32, i32
  }
  func.func @transform_1(%arg0: i32) -> (i32, i32, i32) {
    %c0_i32 = arith.constant 0 : i32
    %c0_i32_0 = arith.constant 0 : i32
    %c0_i32_1 = arith.constant 0 : i32
    %c0_i32_2 = arith.constant 0 : i32
    return %c0_i32, %c0_i32_0, %c0_i32_1 : i32, i32, i32
  }
  func.func @transform_2(%arg0: i32) -> (i32, i32) {
    %c0_i32 = arith.constant 0 : i32
    %c0_i32_0 = arith.constant 0 : i32
    %c0_i32_1 = arith.constant 0 : i32
    return %c0_i32, %c0_i32_0 : i32, i32
  }
  func.func @transform_3(%arg0: i32) -> (i32, i32, i32) {
    %c0_i32 = arith.constant 0 : i32
    %c0_i32_0 = arith.constant 0 : i32
    %c0_i32_1 = arith.constant 0 : i32
    return %arg0, %c0_i32, %c0_i32_0 : i32, i32, i32
  }
}

</mosaic_0001>

<bundles_post_ra>
// kernel: tpu_custom_call.1
= control target key start
LH: loop header
LB: loop body
LE: loop exit
PB: predicated region body
PF: predicated region fallthrough
CT: control target
= control target key end

     0   :  { %8 = vsyncpa [#allocation3], 0  ;;  %s8268_s0 = inlined_call_operand.vmem [shape: bf16[2,18,18,8], index: 0, kind: input, shape index: {}]   ;;  %s8269_s1 = inlined_call_operand.vmem [shape: bf16[9,8,128], index: 1, kind: input, shape index: {}]   ;;  %s8270_s2 = inlined_call_operand.vmem [shape: f32[1,128], index: 2, kind: input, shape index: {}]   ;;  %s8271_s3 = inlined_call_operand.hbm [shape: f32[2,16,256], index: 3, kind: output, shape index: {}]  }
   0x1   :  { %10 = vsyncpa [#allocation3 + $0x1], 0  ;;  %s6422_s12 = smov 0   ;;  %s6424_s13 = smov 0  }
   0x2   :  { %s6426_s14 = smov 0   ;;  %s6428_s15 = smov 0  }
   0x3 LB: > { %s6443_s16 = sadd.s32 4294967295, %s6397_s15   ;;  %s4912_s17 = sadd.s32 4294967294, %s6397_s15   ;;  %s6397_s15 = sphi %s6428_s15, %s8344_s15   ;;  %s6393_s14 = sphi %s6426_s14, %s8343_s14   ;;  %s6389_s13 = sphi %s6424_s13, %s8342_s13   ;;  %s6385_s12 = sphi %s6422_s12, %s8341_s12  }
   0x4   : > { %s6447_s18 = sadd.s32 1, %s6397_s15   ;;  %s91_s19 = sadd.s32 1, %s6393_s14 }
   0x5   : > { %s88_s20 = ssub.s32 %s6397_s15, %s6447_s18  ;;  %p101_p0 = scmp.ne.s32.totalorder %s6393_s14, %s6389_s13 }
   0x6   : > { %p89_p1 = scmp.eq.s32.totalorder %s88_s20, 0  ;;  %p102_p2 = scmp.eq.s32.totalorder %s6443_s16, 1 }
   0x7   : > { %p107_p3 = scmp.ne.s32.totalorder %s6389_s13, %s6385_s12  ;;  %p108_p4 = scmp.eq.s32.totalorder %s4912_s17, 1 }
   0x8   : > { %s6458_s21 = scalar_select %p89_p1, %s6393_s14, %s91_s19  }
   0x9   : > { %p6460_p5 = por %p102_p2, %p101_p0  ;;  %p6464_p6 = por %p108_p4, %p107_p3 }
   0xa   : > { %p4915_p7 = scmp.ge.s32.totalorder %s6397_s15, 1  ;;  %p140_p8 = scmp.lt.s32.totalorder %s6397_s15, 3 }
   0xc   : > { %p141_p9 = pnand %p4915_p7, %p140_p8 }
   0xe   : > { %144 = sbr.rel (%p141_p9) target bundleno = 715 (0x2cb), region = 32 }
  0x15   : > { %v4918_v0 = vld [vmem:[%s8269_s1 + $0x4] sm:$0xf]  ;;  %vm705_vm0 = vcmask 1043456   ;;  %v5145_v1 = vld [vmem:[%s8269_s1 + $0x10] sm:$0xf]  ;;  %p164_p10 = scmp.lt.s32.totalorder %s6443_s16, 1 }
  0x16   : > { %6178 = vmatprep.subr.msk.bf16.mxu1 %vm705_vm0, %v4918_v0  ;;  %6182 = vmatprep.subr.msk.bf16.mxu0 %vm705_vm0, %v5145_v1  ;;  %v707_v2 = vsel %vm705_vm0, %v4918_v0, 0  ;;  %v6481_v3 = vsel %vm705_vm0, %v5145_v1, 0  ;;  %v202_v4 = vld [vmem:[%s8269_s1] sm:$0xf]  ;;  %v5210_v5 = vld [vmem:[%s8269_s1 + $0x14] sm:$0xf] }
  0x17   : > { %8287 = vst [vmem:[#allocation5_spill] sm:$0xff] %v6481_v3  ;;  %5615 = vmatpush3.bf16.msra.mxu1 %v707_v2  ;;  %5751 = vmatpush3.bf16.msra.mxu0 %v6481_v3  ;;  %s165_s28 = scalar_select %p164_p10, %s6443_s16, 1  ;;  %vm219_vm1 = vsmask.f32 3328  ;;  %vm220_vm2 = vsmask.f32 7440 }
  0x18   : > { %6179 = vmatprep.subr.msk.bf16.mxu1 %vm705_vm0, %v202_v4  ;;  %6184 = vmatprep.subr.msk.bf16.mxu0 %vm705_vm0, %v5210_v5  ;;  %vm656_vm3 = vcmask 64512   ;;  %v6509_v17 = vsel %vm705_vm0, %v202_v4, 0  ;;  %v6515_v26 = vld [vmem:[%s8269_s1 + $0x18] sm:$0xf]  ;;  %vm6522_vm4 = vmor %vm219_vm1, %vm220_vm2  ;;  %v6528_v37 = vsel %vm705_vm0, %v5210_v5, 0  ;;  %vm1210_vm5 = vcmask 1042432  }
  0x19   : > { %s6188_s6 = smul.u32 216, %s165_s28  ;;  %v6532_v41 = vsel %vm705_vm0, %v6515_v26, 0  ;;  %vm1211_vm6 = vcmask 1046532   ;;  %s161_s8 = sand.u32 1, %s6389_s13  }
  0x1a   : > { %vm6748_vm7 = vmor %vm1210_vm5, %vm1211_vm6  ;;  %s5460_s17 = sshll.u32 %s6443_s16, 9  ;;  %s8227_s25 = scalar_lea.sflag [#allocation3], %s161_s8 }
  0x1b   : > { %s6496_s9 = scalar_lea.vmem %s8268_s0, %s6188_s6  ;;  %s8225_s24 = scalar_lea.hbm %s8271_s3, %s5460_s17 }
  0x1c   : > { %v170_v6 = vld [vmem:[%s6496_s9] sm:$0xf]  ;;  %v171_v7 = vld [vmem:[%s6496_s9 + $0x4] sm:$0xf]  ;;  %v203_v8 = vld [vmem:[%s6496_s9 + $0x8] sm:$0x1] }
  0x1d   : > { %v223_v9 = vshrl.u32 %v170_v6, 16  ;;  %v226_v10 = vshll.u32 %v170_v6, 16  ;;  %v232_v11 = vshll.u32 %v171_v7, 16  ;;  %v236_v12 = vshrl.u32 %v171_v7, 16  ;;  %v5097_v13 = vld [vmem:[%s6496_s9 + $0xc] sm:$0xf] }
  0x1e   : > { %v242_v14 = vshll.u32 %v203_v8, 16  ;;  %v6503_v15 = vld [vmem:[%s6496_s9 + $0x10] sm:$0xf]  ;;  %v6506_v16 = vld [vmem:[%s6496_s9 + $0x14] sm:$0x1]  ;;  %v2027_v23 = vshrl.u32 %v5097_v13, 16 }
  0x1f   : > { %v225_v18 = vrot.slane %v223_v9, 4  ;;  %v228_v19 = vrot.slane %v226_v10, 5  ;;  %v234_v20 = vrot.slane %v232_v11, 5  ;;  %v238_v21 = vrot.slane %v236_v12, 4  ;;  %v172_v31 = vld [vmem:[%s6496_s9 + $0xc] sm:$0xf] }
  0x20   : > { %v244_v22 = vrot.slane %v242_v14, 5  ;;  %v2030_v24 = vshll.u32 %v5097_v13, 16  ;;  %v2036_v25 = vshll.u32 %v6503_v15, 16  ;;  %v2040_v29 = vshrl.u32 %v6503_v15, 16  ;;  %v173_v36 = vld [vmem:[%s6496_s9 + $0x10] sm:$0xf] }
  0x21   : > { %v229_v27 = vor.u32 %v228_v19, %v225_v18  ;;  %v239_v28 = vor.u32 %v238_v21, %v234_v20  ;;  %v2046_v30 = vshll.u32 %v6506_v16, 16  ;;  %v2029_v33 = vrot.slane %v2027_v23, 4  ;;  %v204_v44 = vld [vmem:[%s6496_s9 + $0x14] sm:$0x1]  ;;  %v5100_v55 = vld [vmem:[%s6496_s9 + $0x18] sm:$0xf] }
  0x22   : > { %v2032_v34 = vrot.slane %v2030_v24, 5  ;;  %v2038_v35 = vrot.slane %v2036_v25, 5  ;;  %v2042_v40 = vrot.slane %v2040_v29, 4  ;;  %v247_v45 = vshrl.u32 %v172_v31, 16  ;;  %v6541_v60 = vld [vmem:[%s6496_s9 + $0x1c] sm:$0xf] }
  0x23   : > { %v230_v38 = vrot.slane %v229_v27, 4  ;;  %v240_v39 = vrot.slane %v239_v28, 4  ;;  %v2048_v43 = vrot.slane %v2046_v30, 5  ;;  %v250_v46 = vshll.u32 %v172_v31, 16  ;;  %v6549_v1 = vld [vmem:[%s6496_s9 + $0x20] sm:$0x1] }
  0x24   : > { %v2033_v42 = vor.u32 %v2032_v34, %v2029_v33  ;;  %v2043_v49 = vor.u32 %v2042_v40, %v2038_v35  ;;  %v256_v50 = vshll.u32 %v173_v36, 16  ;;  %v249_v53 = vrot.slane %v247_v45, 4  ;;  %v174_v18 = vld [vmem:[%s6496_s9 + $0x18] sm:$0xf]  ;;  %v175_v23 = vld [vmem:[%s6496_s9 + $0x1c] sm:$0xf] }
  0x25   : > { %v235_v47 = vsel %vm6522_vm4, %v230_v38, %v234_v20  ;;  %v245_v48 = vsel %vm6522_vm4, %v240_v39, %v244_v22  ;;  %v252_v54 = vrot.slane %v250_v46, 5  ;;  %v260_v58 = vshrl.u32 %v173_v36, 16  ;;  %v205_v31 = vld [vmem:[%s6496_s9 + $0x20] sm:$0x1]  ;;  %v5103_v40 = vld [vmem:[%s6496_s9 + $0x24] sm:$0xf] }
  0x26   : > { %v4919_v51 = vcombine.low %v235_v47, %v245_v48  ;;  %v2034_v52 = vrot.slane %v2033_v42, 4  ;;  %v2044_v56 = vrot.slane %v2043_v49, 4  ;;  %v258_v57 = vrot.slane %v256_v50, 5  ;;  %v6572_v46 = vld [vmem:[%s6496_s9 + $0x28] sm:$0xf]  ;;  %s6399_s16 = smov [#allocation2]  }
  0x27   : > { %v266_v59 = vshll.u32 %v204_v44, 16  ;;  %v2770_v62 = vrot.slane %v6503_v15, 5  ;;  %v2773_v63 = vrot.slane %v6506_v16, 5  ;;  %v253_v0 = vor.u32 %v252_v54, %v249_v53  ;;  %v6581_v54 = vld [vmem:[%s6496_s9 + $0x2c] sm:$0x1]  ;;  %s6339_s27 = sshll.u32 %s6399_s16, 4  ;;  %s6340_s27 = int_to_ptr.vmem [resolvable:$false] %s6339_s27 }
  0x28   : > { %5616 = vmatprep.mubr.msk.bf16.mxu1 %vm656_vm3, %v4919_v51  ;;  %v2039_v61 = vsel %vm6522_vm4, %v2034_v52, %v2038_v35  ;;  %v2049_v2 = vsel %vm6522_vm4, %v2044_v56, %v2048_v43  ;;  %v262_v4 = vrot.slane %v260_v58, 4  ;;  %v2051_v6 = vshrl.u32 %v5100_v55, 16  ;;  %v4999_v51 = vld [vmem:[%s8269_s1 + $0x8] sm:$0xf]  ;;  %v6781_v16 = vld [vmem:[%s6496_s9 + $0x7c] sm:$0xf] }
  0x29   : > { %v268_v5 = vrot.slane %v266_v59, 5  ;;  %v5146_v7 = vcombine.low %v2039_v61, %v2049_v2  ;;  %v254_v8 = vrot.slane %v253_v0, 4  ;;  %v2054_v9 = vshll.u32 %v5100_v55, 16  ;;  %v176_v0 = vld [vmem:[%s6496_s9 + $0x24] sm:$0xf]  ;;  %s6341_s28 = scalar_lea.vmem %s6340_s27, 1024 }
  0x2a   : > { %v2060_v10 = vshll.u32 %v6541_v60, 16  ;;  %v263_v11 = vor.u32 %v262_v4, %v258_v57  ;;  %v2053_v12 = vrot.slane %v2051_v6, 4  ;;  %v2064_v13 = vshrl.u32 %v6541_v60, 16 }
  0x2b   : > { %v2070_v14 = vshll.u32 %v6549_v1, 16  ;;  %5752 = vmatprep.mubr.msk.bf16.mxu0 %vm656_vm3, %v5146_v7  ;;  %v259_v19 = vsel %vm6522_vm4, %v254_v8, %v258_v57  ;;  %v2056_v20 = vrot.slane %v2054_v9, 5  ;;  %v2777_v22 = vrot.slane %v6541_v60, 5  ;;  %v177_v7 = vld [vmem:[%s6496_s9 + $0x28] sm:$0xf] }
  0x2c   : > { %v2062_v21 = vrot.slane %v2060_v10, 5  ;;  %v264_v24 = vrot.slane %v263_v11, 4  ;;  %v2066_v25 = vrot.slane %v2064_v13, 4  ;;  %v2780_v28 = vrot.slane %v6549_v1, 5  ;;  %v206_v13 = vld [vmem:[%s6496_s9 + $0x2c] sm:$0x1] }
  0x2d   : > { %v2072_v27 = vrot.slane %v2070_v14, 5  ;;  %v2057_v29 = vor.u32 %v2056_v20, %v2053_v12  ;;  %v6565_v30 = vrot.slane %v2777_v22, 4  ;;  %v271_v33 = vshrl.u32 %v174_v18, 16 }
  0x2e   : > { %v274_v34 = vshll.u32 %v174_v18, 16  ;;  %v269_v35 = vsel %vm6522_vm4, %v264_v24, %v268_v5  ;;  %v2067_v36 = vor.u32 %v2066_v25, %v2062_v21  ;;  %v280_v38 = vshll.u32 %v175_v23, 16  ;;  %v5106_v24 = vld [vmem:[%s6496_s9 + $0x30] sm:$0xf] }
  0x2f   : > { %v284_v39 = vshrl.u32 %v175_v23, 16  ;;  %v4920_v42 = vcombine.low %v259_v19, %v269_v35  ;;  %v2058_v43 = vrot.slane %v2057_v29, 4  ;;  %v273_v44 = vrot.slane %v271_v33, 4  ;;  %v6601_v33 = vld [vmem:[%s6496_s9 + $0x34] sm:$0xf] }
  0x30   : > { %v276_v45 = vrot.slane %v274_v34, 5  ;;  %v2068_v47 = vrot.slane %v2067_v36, 4  ;;  %v282_v48 = vrot.slane %v280_v38, 5  ;;  %v290_v50 = vshll.u32 %v205_v31, 16 }
  0x31   : > { %v286_v49 = vrot.slane %v284_v39, 4  ;;  %5617 = vmatmul.mubr.msk.bf16.vlgmr.msra.gmra.mrb[0].mxu1 %vm656_vm3, %v4920_v42  ;;  %v2063_v52 = vsel %vm6522_vm4, %v2058_v43, %v2062_v21  ;;  %v2075_v55 = vshrl.u32 %v5103_v40, 16  ;;  %v2078_v56 = vshll.u32 %v5103_v40, 16  ;;  %v6609_v40 = vld [vmem:[%s6496_s9 + $0x38] sm:$0x1] }
  0x32   : > { %v277_v53 = vor.u32 %v276_v45, %v273_v44  ;;  %5649 = vmatpush3.bf16.msra.mxu1 %v6509_v17  ;;  %v2073_v57 = vsel %vm6522_vm4, %v2068_v47, %v2072_v27  ;;  %v292_v59 = vrot.slane %v290_v50, 5  ;;  %v2084_v61 = vshll.u32 %v6572_v46, 16 }
  0x33   : > { %v287_v58 = vor.u32 %v286_v49, %v282_v48  ;;  %v5147_v2 = vcombine.low %v2063_v52, %v2073_v57  ;;  %v2077_v5 = vrot.slane %v2075_v55, 4  ;;  %v2080_v6 = vrot.slane %v2078_v56, 5  ;;  %6180 = vmatprep.subr.msk.bf16.mxu1 %vm705_vm0, %v4999_v51  ;;  %v178_v52 = vld [vmem:[%s6496_s9 + $0x30] sm:$0xf] }
  0x34   : > { %v278_v4 = vrot.slane %v277_v53, 4  ;;  %v2086_v9 = vrot.slane %v2084_v61, 5  ;;  %v2088_v17 = vshrl.u32 %v6572_v46, 16  ;;  %v2094_v10 = vshll.u32 %v6581_v54, 16 }
  0x35   : > { %v288_v8 = vrot.slane %v287_v58, 4  ;;  %5753 = vmatmul.mubr.msk.bf16.vlgmr.msra.gmra.mrb[0].mxu0 %vm656_vm3, %v5147_v2  ;;  %v2081_v12 = vor.u32 %v2080_v6, %v2077_v5  ;;  %v295_v14 = vshrl.u32 %v176_v0, 16  ;;  %v298_v18 = vshll.u32 %v176_v0, 16  ;;  %v179_v58 = vld [vmem:[%s6496_s9 + $0x34] sm:$0xf] }
  0x36   : > { %v283_v11 = vsel %vm6522_vm4, %v278_v4, %v282_v48  ;;  %5785 = vmatpush3.bf16.msra.mxu0 %v6528_v37  ;;  %v2090_v20 = vrot.slane %v2088_v17, 4  ;;  %v2096_v21 = vrot.slane %v2094_v10, 5  ;;  %v304_v23 = vshll.u32 %v177_v7, 16  ;;  %v207_v4 = vld [vmem:[%s6496_s9 + $0x38] sm:$0x1] }
  0x37   : > { %v293_v19 = vsel %vm6522_vm4, %v288_v8, %v292_v59  ;;  %v2082_v27 = vrot.slane %v2081_v12, 4  ;;  %v297_v29 = vrot.slane %v295_v14, 4  ;;  %v300_v31 = vrot.slane %v298_v18, 5  ;;  %6185 = vmatprep.subr.msk.bf16.mxu0 %vm705_vm0, %v6515_v26  ;;  %v5109_v12 = vld [vmem:[%s6496_s9 + $0x3c] sm:$0xf] }
  0x38   : > { %v4921_v25 = vcombine.low %v283_v11, %v293_v19  ;;  %v2091_v34 = vor.u32 %v2090_v20, %v2086_v9  ;;  %v306_v35 = vrot.slane %v304_v23, 5  ;;  %v308_v37 = vshrl.u32 %v177_v7, 16  ;;  %v6626_v20 = vld [vmem:[%s6496_s9 + $0x40] sm:$0xf] }
  0x39   : > { %v314_v36 = vshll.u32 %v206_v13, 16  ;;  %v2087_v38 = vsel %vm6522_vm4, %v2082_v27, %v2086_v9  ;;  %v301_v39 = vor.u32 %v300_v31, %v297_v29  ;;  %v2099_v42 = vshrl.u32 %v5106_v24, 16 }
  0x3a   : > { %5620 = vmatprep.mubr.msk.bf16.mxu1 %vm656_vm3, %v4921_v25  ;;  %v2102_v43 = vshll.u32 %v5106_v24, 16  ;;  %v2092_v44 = vrot.slane %v2091_v34, 4  ;;  %v310_v45 = vrot.slane %v308_v37, 4  ;;  %v2108_v26 = vshll.u32 %v6601_v33, 16  ;;  %v6631_v34 = vld [vmem:[%s6496_s9 + $0x44] sm:$0x1] }
  0x3b   : > { %v316_v47 = vrot.slane %v314_v36, 5  ;;  %v302_v48 = vrot.slane %v301_v39, 4  ;;  %v2101_v49 = vrot.slane %v2099_v42, 4  ;;  %v2112_v51 = vshrl.u32 %v6601_v33, 16  ;;  %v180_v42 = vld [vmem:[%s6496_s9 + $0x3c] sm:$0xf] }
  0x3c   : > { %v2104_v50 = vrot.slane %v2102_v43, 5  ;;  %v2097_v53 = vsel %vm6522_vm4, %v2092_v44, %v2096_v21  ;;  %v311_v55 = vor.u32 %v310_v45, %v306_v35  ;;  %v2110_v56 = vrot.slane %v2108_v26, 5  ;;  %v181_v26 = vld [vmem:[%s6496_s9 + $0x40] sm:$0xf] }
  0x3d   : > { %v2118_v57 = vshll.u32 %v6609_v40, 16  ;;  %v5148_v59 = vcombine.low %v2087_v38, %v2097_v53  ;;  %v307_v61 = vsel %vm6522_vm4, %v302_v48, %v306_v35  ;;  %v2114_v2 = vrot.slane %v2112_v51, 4 }
  0x3e   : > { %v2105_v0 = vor.u32 %v2104_v50, %v2101_v49  ;;  %v312_v5 = vrot.slane %v311_v55, 4  ;;  %v319_v7 = vshrl.u32 %v178_v52, 16  ;;  %v322_v8 = vshll.u32 %v178_v52, 16 }
  0x3f   : > { %v2120_v6 = vrot.slane %v2118_v57, 5  ;;  %5756 = vmatprep.mubr.msk.bf16.mxu0 %vm656_vm3, %v5148_v59  ;;  %v2115_v17 = vor.u32 %v2114_v2, %v2110_v56  ;;  %v328_v10 = vshll.u32 %v179_v58, 16  ;;  %v332_v11 = vshrl.u32 %v179_v58, 16  ;;  %v5112_v2 = vld [vmem:[%s6496_s9 + $0x48] sm:$0xf] }
  0x40   : > { %v2106_v9 = vrot.slane %v2105_v0, 4  ;;  %v317_v13 = vsel %vm6522_vm4, %v312_v5, %v316_v47  ;;  %v321_v14 = vrot.slane %v319_v7, 4  ;;  %v324_v18 = vrot.slane %v322_v8, 5  ;;  %v6649_v8 = vld [vmem:[%s6496_s9 + $0x4c] sm:$0xf] }
  0x41   : > { %v338_v19 = vshll.u32 %v207_v4, 16  ;;  %v4922_v21 = vcombine.low %v307_v61, %v317_v13  ;;  %v2116_v24 = vrot.slane %v2115_v17, 4  ;;  %v330_v25 = vrot.slane %v328_v10, 5  ;;  %v208_v61 = vld [vmem:[%s6496_s9 + $0x44] sm:$0x1] }
  0x42   : > { %v2111_v23 = vsel %vm6522_vm4, %v2106_v9, %v2110_v56  ;;  %v325_v27 = vor.u32 %v324_v18, %v321_v14  ;;  %v334_v29 = vrot.slane %v332_v11, 4  ;;  %v2123_v35 = vshrl.u32 %v5109_v12, 16 }
  0x43   : > { %v340_v31 = vrot.slane %v338_v19, 5  ;;  %5621 = vmatmul.mubr.msk.bf16.gmra.mrb[4].mxu1 %vm656_vm3, %v4922_v21  ;;  %v2121_v37 = vsel %vm6522_vm4, %v2116_v24, %v2120_v6  ;;  %v2126_v36 = vshll.u32 %v5109_v12, 16  ;;  %v2132_v38 = vshll.u32 %v6626_v20, 16 }
  0x44   : > { %v2136_v39 = vshrl.u32 %v6626_v20, 16  ;;  %v5149_v43 = vcombine.low %v2111_v23, %v2121_v37  ;;  %v326_v44 = vrot.slane %v325_v27, 4  ;;  %v335_v45 = vor.u32 %v334_v29, %v330_v25  ;;  %v6657_v23 = vld [vmem:[%s6496_s9 + $0x50] sm:$0x1]  ;;  %v6661_v27 = vld [vmem:[%s6496_s9 + $0x48] sm:$0xf] }
  0x45   : > { %v2125_v47 = vrot.slane %v2123_v35, 4  ;;  %v2128_v48 = vrot.slane %v2126_v36, 5  ;;  %v2134_v49 = vrot.slane %v2132_v38, 5  ;;  %v2142_v51 = vshll.u32 %v6631_v34, 16  ;;  %v6664_v36 = vld [vmem:[%s6496_s9 + $0x4c] sm:$0xf] }
  0x46   : > { %v2138_v50 = vrot.slane %v2136_v39, 4  ;;  %5757 = vmatmul.mubr.msk.bf16.gmra.mrb[4].mxu0 %vm656_vm3, %v5149_v43  ;;  %v331_v52 = vsel %vm6522_vm4, %v326_v44, %v330_v25  ;;  %v336_v53 = vrot.slane %v335_v45, 4  ;;  %v343_v55 = vshrl.u32 %v180_v42, 16 }
  0x47   : > { %v346_v56 = vshll.u32 %v180_v42, 16  ;;  %v2129_v57 = vor.u32 %v2128_v48, %v2125_v47  ;;  %v2144_v59 = vrot.slane %v2142_v51, 5  ;;  %v352_v0 = vshll.u32 %v181_v26, 16 }
  0x48   : > { %v2139_v58 = vor.u32 %v2138_v50, %v2134_v49  ;;  %v341_v4 = vsel %vm6522_vm4, %v336_v53, %v340_v31  ;;  %v345_v5 = vrot.slane %v343_v55, 4  ;;  %v356_v7 = vshrl.u32 %v181_v26, 16  ;;  %v209_v26 = vld [vmem:[%s6496_s9 + $0x50] sm:$0x1]  ;;  %v5115_v53 = vld [vmem:[%s6496_s9 + $0x54] sm:$0xf] }
  0x49   : > { %v348_v6 = vrot.slane %v346_v56, 5  ;;  %v4923_v9 = vcombine.low %v331_v52, %v341_v4  ;;  %v2130_v17 = vrot.slane %v2129_v57, 4  ;;  %v354_v11 = vrot.slane %v352_v0, 5  ;;  %v6680_v4 = vld [vmem:[%s6496_s9 + $0x58] sm:$0xf] }
  0x4a   : > { %v2140_v10 = vrot.slane %v2139_v58, 4  ;;  %v358_v13 = vrot.slane %v356_v7, 4  ;;  %v362_v14 = vshll.u32 %v208_v61, 16  ;;  %v2147_v18 = vshrl.u32 %v5112_v2, 16 }
  0x4b   : > { %v349_v12 = vor.u32 %v348_v6, %v345_v5  ;;  %5624 = vmatprep.mubr.msk.bf16.mxu1 %vm656_vm3, %v4923_v9  ;;  %v2135_v19 = vsel %vm6522_vm4, %v2130_v17, %v2134_v49  ;;  %v2150_v24 = vshll.u32 %v5112_v2, 16  ;;  %v2156_v25 = vshll.u32 %v6649_v8, 16 }
  0x4c   : > { %v2145_v21 = vsel %vm6522_vm4, %v2140_v10, %v2144_v59  ;;  %v359_v35 = vor.u32 %v358_v13, %v354_v11  ;;  %v364_v37 = vrot.slane %v362_v14, 5  ;;  %v2149_v38 = vrot.slane %v2147_v18, 4 }
  0x4d   : > { %v5150_v29 = vcombine.low %v2135_v19, %v2145_v21  ;;  %v350_v31 = vrot.slane %v349_v12, 4  ;;  %v2152_v39 = vrot.slane %v2150_v24, 5  ;;  %v2158_v42 = vrot.slane %v2156_v25, 5  ;;  %v6686_v12 = vld [vmem:[%s6496_s9 + $0x5c] sm:$0x1] }
  0x4e   : > { %v2160_v43 = vshrl.u32 %v6649_v8, 16  ;;  %v360_v45 = vrot.slane %v359_v35, 4  ;;  %v2166_v47 = vshll.u32 %v6657_v23, 16  ;;  %v367_v48 = vshrl.u32 %v6661_v27, 16  ;;  %v6690_v24 = vld [vmem:[%s6496_s9 + $0x54] sm:$0xf] }
  0x4f   : > { %5760 = vmatprep.mubr.msk.bf16.mxu0 %vm656_vm3, %v5150_v29  ;;  %v355_v44 = vsel %vm6522_vm4, %v350_v31, %v354_v11  ;;  %v2153_v49 = vor.u32 %v2152_v39, %v2149_v38  ;;  %v370_v51 = vshll.u32 %v6661_v27, 16  ;;  %v376_v52 = vshll.u32 %v6664_v36, 16 }
  0x50   : > { %v2162_v50 = vrot.slane %v2160_v43, 4  ;;  %v365_v55 = vsel %vm6522_vm4, %v360_v45, %v364_v37  ;;  %v2168_v56 = vrot.slane %v2166_v47, 5  ;;  %v369_v57 = vrot.slane %v367_v48, 4  ;;  %v6696_v37 = vld [vmem:[%s6496_s9 + $0x58] sm:$0xf] }
  0x51   : > { %v380_v58 = vshrl.u32 %v6664_v36, 16  ;;  %v4924_v59 = vcombine.low %v355_v44, %v365_v55  ;;  %v2154_v61 = vrot.slane %v2153_v49, 4  ;;  %v372_v2 = vrot.slane %v370_v51, 5 }
  0x52   : > { %v2163_v0 = vor.u32 %v2162_v50, %v2158_v42  ;;  %v378_v5 = vrot.slane %v376_v52, 5  ;;  %v386_v7 = vshll.u32 %v209_v26, 16  ;;  %v2171_v9 = vshrl.u32 %v5115_v53, 16  ;;  %v210_v26 = vld [vmem:[%s6496_s9 + $0x5c] sm:$0x1] }
  0x53   : > { %v382_v6 = vrot.slane %v380_v58, 4  ;;  %5625 = vmatmul.mubr.msk.bf16.gmra.mrb[8].mxu1 %vm656_vm3, %v4924_v59  ;;  %v2159_v17 = vsel %vm6522_vm4, %v2154_v61, %v2158_v42  ;;  %v373_v11 = vor.u32 %v372_v2, %v369_v57  ;;  %v2174_v13 = vshll.u32 %v5115_v53, 16  ;;  %v5118_v53 = vld [vmem:[%s6496_s9 + $0x60] sm:$0xf]  ;;  %v6710_v59 = vld [vmem:[%s6496_s9 + $0x64] sm:$0xf] }
  0x54   : > { %v2164_v10 = vrot.slane %v2163_v0, 4  ;;  %v388_v18 = vrot.slane %v386_v7, 5  ;;  %v2173_v19 = vrot.slane %v2171_v9, 4  ;;  %v2180_v21 = vshll.u32 %v6680_v4, 16  ;;  %v6717_v9 = vld [vmem:[%s6496_s9 + $0x68] sm:$0x1] }
  0x55   : > { %v383_v14 = vor.u32 %v382_v6, %v378_v5  ;;  %v374_v29 = vrot.slane %v373_v11, 4  ;;  %v2176_v31 = vrot.slane %v2174_v13, 5  ;;  %v2184_v35 = vshrl.u32 %v6680_v4, 16 }
  0x56   : > { %v2169_v25 = vsel %vm6522_vm4, %v2164_v10, %v2168_v56  ;;  %v2182_v42 = vrot.slane %v2180_v21, 5  ;;  %v2190_v43 = vshll.u32 %v6686_v12, 16  ;;  %v391_v48 = vshrl.u32 %v6690_v24, 16 }
  0x57   : > { %v5151_v38 = vcombine.low %v2159_v17, %v2169_v25  ;;  %v384_v39 = vrot.slane %v383_v14, 4  ;;  %v379_v44 = vsel %vm6522_vm4, %v374_v29, %v378_v5  ;;  %v2177_v45 = vor.u32 %v2176_v31, %v2173_v19  ;;  %v6721_v19 = vld [vmem:[%s6496_s9 + $0x60] sm:$0xf] }
  0x58   : > { %v2186_v47 = vrot.slane %v2184_v35, 4  ;;  %v2192_v50 = vrot.slane %v2190_v43, 5  ;;  %v394_v51 = vshll.u32 %v6690_v24, 16  ;;  %v400_v52 = vshll.u32 %v6696_v37, 16  ;;  %v6727_v35 = vld [vmem:[%s6496_s9 + $0x64] sm:$0xf] }
  0x59   : > { %5761 = vmatmul.mubr.msk.bf16.gmra.mrb[8].mxu0 %vm656_vm3, %v5151_v38  ;;  %v389_v49 = vsel %vm6522_vm4, %v384_v39, %v388_v18  ;;  %v2178_v56 = vrot.slane %v2177_v45, 4  ;;  %v393_v58 = vrot.slane %v391_v48, 4  ;;  %v404_v2 = vshrl.u32 %v6696_v37, 16 }
  0x5a   : > { %v4925_v55 = vcombine.low %v379_v44, %v389_v49  ;;  %v2187_v57 = vor.u32 %v2186_v47, %v2182_v42  ;;  %v396_v61 = vrot.slane %v394_v51, 5  ;;  %v402_v0 = vrot.slane %v400_v52, 5 }
  0x5b   : > { %v410_v5 = vshll.u32 %v210_v26, 16  ;;  %v2183_v6 = vsel %vm6522_vm4, %v2178_v56, %v2182_v42  ;;  %v2195_v17 = vshrl.u32 %v5118_v53, 16  ;;  %v2198_v10 = vshll.u32 %v5118_v53, 16 }
  0x5c   : > { %5628 = vmatprep.mubr.msk.bf16.mxu1 %vm656_vm3, %v4925_v55  ;;  %v2188_v7 = vrot.slane %v2187_v57, 4  ;;  %v397_v11 = vor.u32 %v396_v61, %v393_v58  ;;  %v406_v13 = vrot.slane %v404_v2, 4  ;;  %v2204_v18 = vshll.u32 %v6710_v59, 16  ;;  %v5178_v58 = vld [vmem:[%s6496_s9 + $0xc] sm:$0xe] }
  0x5d   : > { %v412_v14 = vrot.slane %v410_v5, 5  ;;  %v2197_v25 = vrot.slane %v2195_v17, 4  ;;  %v2200_v29 = vrot.slane %v2198_v10, 5  ;;  %v2208_v31 = vshrl.u32 %v6710_v59, 16 }
  0x5e   : > { %v2193_v21 = vsel %vm6522_vm4, %v2188_v7, %v2192_v50  ;;  %v398_v39 = vrot.slane %v397_v11, 4  ;;  %v407_v42 = vor.u32 %v406_v13, %v402_v0  ;;  %v2206_v43 = vrot.slane %v2204_v18, 5  ;;  %v211_v50 = vld [vmem:[%s6496_s9 + $0x68] sm:$0x1] }
  0x5f   : > { %v5152_v38 = vcombine.low %v2183_v6, %v2193_v21  ;;  %v2201_v44 = vor.u32 %v2200_v29, %v2197_v25  ;;  %v2210_v45 = vrot.slane %v2208_v31, 4  ;;  %v2214_v47 = vshll.u32 %v6717_v9, 16  ;;  %v6755_v29 = vld [vmem:[%s6496_s9 + $0x70] sm:$0xf] }
  0x60   : > { %v415_v26 = vshrl.u32 %v6721_v19, 16  ;;  %v403_v48 = vsel %vm6522_vm4, %v398_v39, %v402_v0  ;;  %v408_v49 = vrot.slane %v407_v42, 4  ;;  %v418_v51 = vshll.u32 %v6721_v19, 16  ;;  %v6742_v0 = vld [vmem:[%s6496_s9 + $0x6c] sm:$0xf] }
  0x61   : > { %5764 = vmatprep.mubr.msk.bf16.mxu0 %vm656_vm3, %v5152_v38  ;;  %v424_v52 = vshll.u32 %v6727_v35, 16  ;;  %v2202_v53 = vrot.slane %v2201_v44, 4  ;;  %v2211_v55 = vor.u32 %v2210_v45, %v2206_v43  ;;  %v2216_v56 = vrot.slane %v2214_v47, 5 }
  0x62   : > { %v417_v57 = vrot.slane %v415_v26, 4  ;;  %v413_v61 = vsel %vm6522_vm4, %v408_v49, %v412_v14  ;;  %v420_v2 = vrot.slane %v418_v51, 5  ;;  %v428_v6 = vshrl.u32 %v6727_v35, 16  ;;  %v212_v26 = vld [vmem:[%s6496_s9 + $0x74] sm:$0x1] }
  0x63   : > { %v426_v5 = vrot.slane %v424_v52, 5  ;;  %v4926_v7 = vcombine.low %v403_v48, %v413_v61  ;;  %v2207_v17 = vsel %vm6522_vm4, %v2202_v53, %v2206_v43  ;;  %v2212_v10 = vrot.slane %v2211_v55, 4  ;;  %v5179_v48 = vld [vmem:[%s6496_s9 + $0x18] sm:$0xe] }
  0x64   : > { %v434_v11 = vshll.u32 %v211_v50, 16  ;;  %v421_v14 = vor.u32 %v420_v2, %v417_v57  ;;  %v430_v18 = vrot.slane %v428_v6, 4  ;;  %v5194_v21 = vrot.slane %v5178_v58, 9  ;;  %v6774_v53 = vld [vmem:[%s6496_s9 + $0x78] sm:$0xf] }
  0x65   : > { %v2772_v25 = vrot.slane %v2770_v62, 4  ;;  %5629 = vmatmul.mubr.msk.bf16.gmra.mrb[12].mxu1 %vm656_vm3, %v4926_v7  ;;  %v2217_v31 = vsel %vm6522_vm4, %v2212_v10, %v2216_v56  ;;  %v439_v39 = vshrl.u32 %v6742_v0, 16  ;;  %v442_v42 = vshll.u32 %v6742_v0, 16  ;;  %v213_v57 = vld [vmem:[%s6496_s9 + $0x80] sm:$0x1] }
  0x66   : > { %v436_v38 = vrot.slane %v434_v11, 5  ;;  %v5153_v43 = vcombine.low %v2207_v17, %v2217_v31  ;;  %v422_v44 = vrot.slane %v421_v14, 4  ;;  %v431_v45 = vor.u32 %v430_v18, %v426_v5  ;;  %v5180_v10 = vld [vmem:[%s6496_s9 + $0x24] sm:$0xe] }
  0x67   : > { %v2771_v47 = vsel %vm6748_vm7, %v5194_v21, %v2770_v62  ;;  %v2774_v49 = vsel %vm6748_vm7, %v2772_v25, %v2773_v63  ;;  %v441_v50 = vrot.slane %v439_v39, 4  ;;  %v444_v51 = vrot.slane %v442_v42, 5  ;;  %v6800_v39 = vld [vmem:[%s6496_s9 + $0x84] sm:$0xf] }
  0x68   : > { %v448_v52 = vshll.u32 %v6755_v29, 16  ;;  %5765 = vmatmul.mubr.msk.bf16.gmra.mrb[12].mxu0 %vm656_vm3, %v5153_v43  ;;  %v427_v15 = vsel %vm6522_vm4, %v422_v44, %v426_v5  ;;  %v432_v62 = vrot.slane %v431_v45, 4  ;;  %v5211_v55 = vcombine.low %v2771_v47, %v2774_v49  ;;  %v6808_v43 = vld [vmem:[%s6496_s9 + $0x88] sm:$0xf] }
  0x69   : > { %v452_v56 = vshrl.u32 %v6755_v29, 16  ;;  %v445_v63 = vor.u32 %v444_v51, %v441_v50  ;;  %v458_v61 = vshll.u32 %v212_v26, 16  ;;  %v5195_v2 = vrot.slane %v5179_v48, 9 }
  0x6a   : > { %v450_v58 = vrot.slane %v448_v52, 5  ;;  %v437_v6 = vsel %vm6522_vm4, %v432_v62, %v436_v38  ;;  %5786 = vmatprep.mubr.msk.bf16.mxu0 %vm656_vm3, %v5211_v55  ;;  %v2781_v5 = vsel %vm6748_vm7, %v6565_v30, %v2780_v28  ;;  %v463_v17 = vshrl.u32 %v6774_v53, 16  ;;  %v214_v52 = vld [vmem:[%s6496_s9 + $0x8c] sm:$0x1] }
  0x6b   : > { %v454_v7 = vrot.slane %v452_v56, 4  ;;  %v4927_v11 = vcombine.low %v427_v15, %v437_v6  ;;  %v446_v14 = vrot.slane %v445_v63, 4  ;;  %v460_v18 = vrot.slane %v458_v61, 5 }
  0x6c   : > { %v2778_v21 = vsel %vm6748_vm7, %v5195_v2, %v2777_v22  ;;  %v465_v38 = vrot.slane %v463_v17, 4  ;;  %v466_v1 = vshll.u32 %v6774_v53, 16  ;;  %v472_v30 = vshll.u32 %v6781_v16, 16  ;;  %v6813_v22 = vld [vmem:[%s8269_s1 + $0x1c] sm:$0xf] }
  0x6d   : > { %v455_v25 = vor.u32 %v454_v7, %v450_v58  ;;  %v5212_v31 = vcombine.low %v2778_v21, %v2781_v5  ;;  %5632 = vmatprep.mubr.msk.bf16.mxu1 %vm656_vm3, %v4927_v11  ;;  %v451_v28 = vsel %vm6522_vm4, %v446_v14, %v450_v58  ;;  %v476_v60 = vshrl.u32 %v6781_v16, 16  ;;  %v6832_v5 = vld [vmem:[%s6496_s9 + $0x90] sm:$0xf] }
  0x6e   : > { %v482_v42 = vshll.u32 %v213_v57, 16  ;;  %v468_v45 = vrot.slane %v466_v1, 5  ;;  %v5196_v47 = vrot.slane %v5180_v10, 9  ;;  %v2784_v26 = vrot.slane %v6572_v46, 5  ;;  %v5181_v57 = vld [vmem:[%s6496_s9 + $0x30] sm:$0xe] }
  0x6f   : > { %v456_v44 = vrot.slane %v455_v25, 4  ;;  %v474_v48 = vrot.slane %v472_v30, 5  ;;  %v478_v49 = vrot.slane %v476_v60, 4  ;;  %v2787_v51 = vrot.slane %v6581_v54, 5  ;;  %v6844_v30 = vld [vmem:[%s6496_s9 + $0x94] sm:$0xf] }
  0x70   : > { %v484_v50 = vrot.slane %v482_v42, 5  ;;  %5787 = vmatmul.mubr.msk.bf16.vlgmr.msra.gmra.mrb[0].mxu0 %vm656_vm3, %v5212_v31  ;;  %v469_v62 = vor.u32 %v468_v45, %v465_v38  ;;  %v2785_v55 = vsel %vm6748_vm7, %v5196_v47, %v2784_v26  ;;  %v2786_v56 = vrot.slane %v2784_v26, 4  ;;  %v215_v60 = vld [vmem:[%s6496_s9 + $0x98] sm:$0x1]  ;;  %v5182_v26 = vld [vmem:[%s6496_s9 + $0x3c] sm:$0xe] }
  0x71   : > { %v461_v15 = vsel %vm6522_vm4, %v456_v44, %v460_v18  ;;  %5819 = vmatpush3.bf16.msra.mxu0 %v6532_v41  ;;  %v479_v46 = vor.u32 %v478_v49, %v474_v48  ;;  %v487_v58 = vshrl.u32 %v6800_v39, 16  ;;  %v490_v54 = vshll.u32 %v6800_v39, 16 }
  0x72   : > { %v4928_v63 = vcombine.low %v451_v28, %v461_v15  ;;  %v470_v61 = vrot.slane %v469_v62, 4  ;;  %v2788_v2 = vsel %vm6748_vm7, %v2786_v56, %v2787_v51  ;;  %v496_v6 = vshll.u32 %v6808_v43, 16  ;;  %6186 = vmatprep.subr.msk.bf16.mxu0 %vm705_vm0, %v6813_v22 }
  0x73   : > { %v500_v7 = vshrl.u32 %v6808_v43, 16  ;;  %v480_v41 = vrot.slane %v479_v46, 4  ;;  %v5213_v17 = vcombine.low %v2785_v55, %v2788_v2  ;;  %v489_v10 = vrot.slane %v487_v58, 4  ;;  %v6864_v46 = vld [vmem:[%s6496_s9 + $0xa0] sm:$0xf] }
  0x74   : > { %5633 = vmatmul.mubr.msk.bf16.gmra.mrb[16].mxu1 %vm656_vm3, %v4928_v63  ;;  %v492_v11 = vrot.slane %v490_v54, 5  ;;  %v475_v14 = vsel %vm6522_vm4, %v470_v61, %v474_v48  ;;  %v498_v18 = vrot.slane %v496_v6, 5  ;;  %v506_v25 = vshll.u32 %v214_v52, 16  ;;  %v6853_v52 = vld [vmem:[%s6496_s9 + $0x9c] sm:$0xf] }
  0x75   : > { %v502_v21 = vrot.slane %v500_v7, 4  ;;  %v485_v31 = vsel %vm6522_vm4, %v480_v41, %v484_v50  ;;  %5790 = vmatprep.mubr.msk.bf16.mxu0 %vm656_vm3, %v5213_v17  ;;  %v5197_v1 = vrot.slane %v5181_v57, 9  ;;  %v2791_v28 = vrot.slane %v6601_v33, 5 }
  0x76   : > { %v493_v38 = vor.u32 %v492_v11, %v489_v10  ;;  %v4929_v42 = vcombine.low %v475_v14, %v485_v31  ;;  %v508_v45 = vrot.slane %v506_v25, 5  ;;  %v2794_v47 = vrot.slane %v6609_v40, 5  ;;  %v216_v10 = vld [vmem:[%s6496_s9 + $0xa4] sm:$0x1]  ;;  %v5183_v11 = vld [vmem:[%s6496_s9 + $0x48] sm:$0xe] }
  0x77   : > { %v503_v44 = vor.u32 %v502_v21, %v498_v18  ;;  %v2792_v49 = vsel %vm6748_vm7, %v5197_v1, %v2791_v28  ;;  %v2793_v50 = vrot.slane %v2791_v28, 4  ;;  %v511_v51 = vshrl.u32 %v6832_v5, 16 }
  0x78   : > { %v494_v48 = vrot.slane %v493_v38, 4  ;;  %5636 = vmatprep.mubr.msk.bf16.mxu1 %vm656_vm3, %v4929_v42  ;;  %v514_v15 = vshll.u32 %v6832_v5, 16  ;;  %v520_v62 = vshll.u32 %v6844_v30, 16  ;;  %v524_v40 = vshrl.u32 %v6844_v30, 16 }
  0x79   : > { %v504_v33 = vrot.slane %v503_v44, 4  ;;  %v2795_v56 = vsel %vm6748_vm7, %v2793_v50, %v2794_v47  ;;  %v513_v57 = vrot.slane %v511_v51, 4  ;;  %v530_v63 = vshll.u32 %v215_v60, 16 }
  0x7a   : > { %v499_v55 = vsel %vm6522_vm4, %v494_v48, %v498_v18  ;;  %v5214_v54 = vcombine.low %v2792_v49, %v2795_v56  ;;  %v516_v61 = vrot.slane %v514_v15, 5  ;;  %v522_v2 = vrot.slane %v520_v62, 5  ;;  %v6890_v56 = vld [vmem:[%s6496_s9 + $0xac] sm:$0xf] }
  0x7b   : > { %v509_v58 = vsel %vm6522_vm4, %v504_v33, %v508_v45  ;;  %v526_v7 = vrot.slane %v524_v40, 4  ;;  %v532_v41 = vrot.slane %v530_v63, 5  ;;  %v5198_v17 = vrot.slane %v5182_v26, 9  ;;  %v6885_v33 = vld [vmem:[%s6496_s9 + $0xa8] sm:$0xf] }
  0x7c   : > { %v4930_v6 = vcombine.low %v499_v55, %v509_v58  ;;  %5791 = vmatmul.mubr.msk.bf16.gmra.mrb[4].mxu0 %vm656_vm3, %v5214_v54  ;;  %v517_v14 = vor.u32 %v516_v61, %v513_v57  ;;  %v2798_v18 = vrot.slane %v6626_v20, 5  ;;  %v2801_v21 = vrot.slane %v6631_v34, 5  ;;  %v217_v61 = vld [vmem:[%s6496_s9 + $0xb0] sm:$0x1] }
  0x7d   : > { %v535_v25 = vshrl.u32 %v6853_v52, 16  ;;  %v527_v31 = vor.u32 %v526_v7, %v522_v2  ;;  %v538_v38 = vshll.u32 %v6853_v52, 16  ;;  %v544_v1 = vshll.u32 %v6864_v46, 16 }
  0x7e   : > { %5637 = vmatmul.mubr.msk.bf16.gmra.mrb[20].mxu1 %vm656_vm3, %v4930_v6  ;;  %v548_v28 = vshrl.u32 %v6864_v46, 16  ;;  %v518_v60 = vrot.slane %v517_v14, 4  ;;  %v2799_v42 = vsel %vm6748_vm7, %v5198_v17, %v2798_v18  ;;  %v2800_v20 = vrot.slane %v2798_v18, 4  ;;  %v6905_v14 = vld [vmem:[%s6496_s9 + $0xb4] sm:$0xf] }
  0x7f   : > { %v537_v44 = vrot.slane %v535_v25, 4  ;;  %v528_v34 = vrot.slane %v527_v31, 4  ;;  %v540_v45 = vrot.slane %v538_v38, 5  ;;  %v546_v47 = vrot.slane %v544_v1, 5 }
  0x80   : > { %v550_v26 = vrot.slane %v548_v28, 4  ;;  %v523_v48 = vsel %vm6522_vm4, %v518_v60, %v522_v2  ;;  %v2802_v49 = vsel %vm6748_vm7, %v2800_v20, %v2801_v21  ;;  %v554_v50 = vshll.u32 %v216_v10, 16  ;;  %v5184_v2 = vld [vmem:[%s6496_s9 + $0x54] sm:$0xe] }
  0x81   : > { %v5199_v51 = vrot.slane %v5183_v11, 9  ;;  %v533_v15 = vsel %vm6522_vm4, %v528_v34, %v532_v41  ;;  %v5215_v62 = vcombine.low %v2799_v42, %v2802_v49  ;;  %v541_v40 = vor.u32 %v540_v45, %v537_v44  ;;  %v6914_v42 = vld [vmem:[%s6496_s9 + $0xb8] sm:$0xf]  ;;  %v218_v49 = vld [vmem:[%s6496_s9 + $0xbc] sm:$0x1] }
  0x82   : > { %v551_v55 = vor.u32 %v550_v26, %v546_v47  ;;  %v4931_v57 = vcombine.low %v523_v48, %v533_v15  ;;  %v556_v63 = vrot.slane %v554_v50, 5  ;;  %v2805_v58 = vrot.slane %v6649_v8, 5 }
  0x83   : > { %v2808_v54 = vrot.slane %v6657_v23, 5  ;;  %5794 = vmatprep.mubr.msk.bf16.mxu0 %vm656_vm3, %v5215_v62  ;;  %v542_v6 = vrot.slane %v541_v40, 4  ;;  %v559_v41 = vshrl.u32 %v6885_v33, 16  ;;  %v562_v17 = vshll.u32 %v6885_v33, 16 }
  0x84   : > { %v552_v7 = vrot.slane %v551_v55, 4  ;;  %5640 = vmatprep.mubr.msk.bf16.mxu1 %vm656_vm3, %v4931_v57  ;;  %v2806_v10 = vsel %vm6748_vm7, %v5199_v51, %v2805_v58  ;;  %v2807_v11 = vrot.slane %v2805_v58, 4  ;;  %v568_v8 = vshll.u32 %v6890_v56, 16  ;;  %v5185_v55 = vld [vmem:[%s6496_s9 + $0x60] sm:$0xe] }
  0x85   : > { %v572_v23 = vshrl.u32 %v6890_v56, 16  ;;  %v547_v18 = vsel %vm6522_vm4, %v542_v6, %v546_v47  ;;  %v561_v25 = vrot.slane %v559_v41, 4  ;;  %v564_v31 = vrot.slane %v562_v17, 5  ;;  %v5186_v6 = vld [vmem:[%s6496_s9 + $0x6c] sm:$0xe] }
  0x86   : > { %v557_v21 = vsel %vm6522_vm4, %v552_v7, %v556_v63  ;;  %v2809_v1 = vsel %vm6748_vm7, %v2807_v11, %v2808_v54  ;;  %v570_v28 = vrot.slane %v568_v8, 5  ;;  %v578_v34 = vshll.u32 %v217_v61, 16  ;;  %v5122_v11 = vld [vmem:[%s6496_s9 + $0x70] sm:$0xf]  ;;  %v5123_v8 = vld [vmem:[%s6496_s9 + $0x74] sm:$0x1] }
  0x87   : > { %v4932_v38 = vcombine.low %v547_v18, %v557_v21  ;;  %v574_v60 = vrot.slane %v572_v23, 4  ;;  %v5216_v20 = vcombine.low %v2806_v10, %v2809_v1  ;;  %v565_v44 = vor.u32 %v564_v31, %v561_v25 }
  0x88   : > { %v5200_v45 = vrot.slane %v5184_v2, 9  ;;  %v2812_v26 = vrot.slane %v6680_v4, 5  ;;  %v2815_v48 = vrot.slane %v6686_v12, 5  ;;  %v583_v50 = vshrl.u32 %v6905_v14, 16 }
  0x89   : > { %5641 = vmatmul.mubr.msk.bf16.gmra.mrb[24].mxu1 %vm656_vm3, %v4932_v38  ;;  %v575_v47 = vor.u32 %v574_v60, %v570_v28  ;;  %5795 = vmatmul.mubr.msk.bf16.gmra.mrb[8].mxu0 %vm656_vm3, %v5216_v20  ;;  %v566_v51 = vrot.slane %v565_v44, 4  ;;  %v580_v15 = vrot.slane %v578_v34, 5  ;;  %v586_v62 = vshll.u32 %v6905_v14, 16 }
  0x8a   : > { %v592_v40 = vshll.u32 %v6914_v42, 16  ;;  %v2813_v4 = vsel %vm6748_vm7, %v5200_v45, %v2812_v26  ;;  %v2814_v12 = vrot.slane %v2812_v26, 4  ;;  %v585_v63 = vrot.slane %v583_v50, 4 }
  0x8b   : > { %v576_v57 = vrot.slane %v575_v47, 4  ;;  %v571_v58 = vsel %vm6522_vm4, %v566_v51, %v570_v28  ;;  %v588_v54 = vrot.slane %v586_v62, 5  ;;  %v596_v2 = vshrl.u32 %v6914_v42, 16  ;;  %v5187_v47 = vld [vmem:[%s6496_s9 + $0x78] sm:$0xe] }
  0x8c   : > { %v594_v61 = vrot.slane %v592_v40, 5  ;;  %v2816_v41 = vsel %vm6748_vm7, %v2814_v12, %v2815_v48  ;;  %v602_v17 = vshll.u32 %v218_v49, 16  ;;  %v5201_v10 = vrot.slane %v5185_v55, 9  ;;  %v6278_v51 = vld [vmem:[%s6496_s9] sm:$0xf] }
  0x8d   : > { %v581_v7 = vsel %vm6522_vm4, %v576_v57, %v580_v15  ;;  %v5217_v18 = vcombine.low %v2813_v4, %v2816_v41  ;;  %v589_v21 = vor.u32 %v588_v54, %v585_v63  ;;  %v598_v25 = vrot.slane %v596_v2, 4  ;;  %v6952_v15 = vld [vmem:[%s6496_s9 + $0x4] sm:$0xf]  ;;  %v6956_v40 = vld [vmem:[%s6496_s9 + $0x7c] sm:$0xf] }
  0x8e   : > { %v4933_v23 = vcombine.low %v571_v58, %v581_v7  ;;  %v604_v31 = vrot.slane %v602_v17, 5  ;;  %v2819_v38 = vrot.slane %v6710_v59, 5  ;;  %v2822_v1 = vrot.slane %v6717_v9, 5  ;;  %v6959_v55 = vld [vmem:[%s6496_s9 + $0x80] sm:$0x1] }
  0x8f   : > { %v5202_v28 = vrot.slane %v5186_v6, 9  ;;  %5798 = vmatprep.mubr.msk.bf16.mxu0 %vm656_vm3, %v5217_v18  ;;  %v590_v60 = vrot.slane %v589_v21, 4  ;;  %v599_v20 = vor.u32 %v598_v25, %v594_v61  ;;  %v2826_v44 = vrot.slane %v5122_v11, 5  ;;  %v5128_v57 = vld [vmem:[%s6496_s9 + $0x88] sm:$0xf] }
  0x90   : > { %5644 = vmatprep.mubr.msk.bf16.mxu1 %vm656_vm3, %v4933_v23  ;;  %v2829_v34 = vrot.slane %v5123_v8, 5  ;;  %v2820_v45 = vsel %vm6748_vm7, %v5201_v10, %v2819_v38  ;;  %v2821_v59 = vrot.slane %v2819_v38, 4  ;;  %v4951_v62 = vcombine.low %v6278_v51, %v6952_v15  ;;  %v5129_v54 = vld [vmem:[%s6496_s9 + $0x8c] sm:$0x1]  ;;  %v5131_v17 = vld [vmem:[%s6496_s9 + $0x94] sm:$0xf] }
  0x91   : > { %v595_v9 = vsel %vm6522_vm4, %v590_v60, %v594_v61  ;;  %v600_v26 = vrot.slane %v599_v20, 4  ;;  %v2827_v48 = vsel %vm6748_vm7, %v5202_v28, %v2826_v44  ;;  %v2828_v49 = vrot.slane %v2826_v44, 4  ;;  %v5188_v61 = vld [vmem:[%s6496_s9 + $0x84] sm:$0xe]  ;;  %v5189_v23 = vld [vmem:[%s6496_s9 + $0x90] sm:$0xe] }
  0x92   : > { %v2823_v50 = vsel %vm6748_vm7, %v2821_v59, %v2822_v1  ;;  %v5203_v58 = vrot.slane %v5187_v47, 9  ;;  %v2833_v7 = vrot.slane %v6956_v40, 5  ;;  %v2836_v41 = vrot.slane %v6959_v55, 5  ;;  %v5132_v25 = vld [vmem:[%s6496_s9 + $0x98] sm:$0x1] }
  0x93   : > { %v605_v4 = vsel %vm6522_vm4, %v600_v26, %v604_v31  ;;  %v5218_v12 = vcombine.low %v2820_v45, %v2823_v50  ;;  %v2830_v63 = vsel %vm6748_vm7, %v2828_v49, %v2829_v34  ;;  %v5204_v10 = vrot.slane %v5188_v61, 9  ;;  %v5134_v31 = vld [vmem:[%s6496_s9 + $0xa0] sm:$0xf]  ;;  %v5135_v60 = vld [vmem:[%s6496_s9 + $0xa4] sm:$0x1] }
  0x94   : > { %v4934_v2 = vcombine.low %v595_v9, %v605_v4  ;;  %v5219_v6 = vcombine.low %v2827_v48, %v2830_v63  ;;  %v2840_v11 = vrot.slane %v5128_v57, 5  ;;  %v2843_v8 = vrot.slane %v5129_v54, 5  ;;  %v5190_v20 = vld [vmem:[%s6496_s9 + $0x9c] sm:$0xe]  ;;  %v6280_v44 = vld [vmem:[%s6496_s9 + $0xc] sm:$0xf] }
  0x95   : > { %5799 = vmatmul.mubr.msk.bf16.gmra.mrb[12].mxu0 %vm656_vm3, %v5218_v12  ;;  %v2834_v18 = vsel %vm6748_vm7, %v5203_v58, %v2833_v7  ;;  %v2835_v21 = vrot.slane %v2833_v7, 4  ;;  %v2847_v28 = vrot.slane %v5131_v17, 5  ;;  %v6986_v34 = vld [vmem:[%s6496_s9 + $0x10] sm:$0xf]  ;;  %v6282_v47 = vld [vmem:[%s6496_s9 + $0x18] sm:$0xf] }
  0x96   : > { %5645 = vmatmul.mubr.msk.bf16.gmra.mrb[28].mxu1 %vm656_vm3, %v4934_v2  ;;  %5802 = vmatprep.mubr.msk.bf16.mxu0 %vm656_vm3, %v5219_v6  ;;  %v2841_v38 = vsel %vm6748_vm7, %v5204_v10, %v2840_v11  ;;  %v2842_v1 = vrot.slane %v2840_v11, 4  ;;  %v4952_v45 = vcombine.low %v6280_v44, %v6986_v34  ;;  %v6993_v9 = vld [vmem:[%s6496_s9 + $0x1c] sm:$0xf]  ;;  %v5205_v48 = vrot.slane %v5189_v23, 9  ;;  %v5137_v57 = vld [vmem:[%s6496_s9 + $0xac] sm:$0xf] }
  0x97   : > { %5650 = vmatprep.mubr.msk.bf16.mxu1 %vm656_vm3, %v4951_v62  ;;  %v2837_v59 = vsel %vm6748_vm7, %v2835_v21, %v2836_v41  ;;  %v4953_v26 = vcombine.low %v6282_v47, %v6993_v9  ;;  %v2849_v51 = vrot.slane %v2847_v28, 4  ;;  %v2850_v62 = vrot.slane %v5132_v25, 5  ;;  %v6284_v54 = vld [vmem:[%s8269_s1 + $0x8] sm:$0xf]  ;;  %v5140_v2 = vld [vmem:[%s6496_s9 + $0xb8] sm:$0xf] }
  0x98   : > { %v5220_v49 = vcombine.low %v2834_v18, %v2837_v59  ;;  %v2844_v50 = vsel %vm6748_vm7, %v2842_v1, %v2843_v8  ;;  %v5206_v12 = vrot.slane %v5190_v20, 9  ;;  %v2854_v63 = vrot.slane %v5134_v31, 5  ;;  %v7008_v7 = vld [vmem:[%s8269_s1 + $0xc] sm:$0xf]  ;;  %v5138_v10 = vld [vmem:[%s6496_s9 + $0xb0] sm:$0x1] }
  0x99   : > { %v5221_v4 = vcombine.low %v2841_v38, %v2844_v50  ;;  %v2857_v58 = vrot.slane %v5135_v60, 5  ;;  %v1424_v61 = vsel %vm705_vm0, %v6284_v54, 0  ;;  %v2848_v41 = vsel %vm6748_vm7, %v5205_v48, %v2847_v28  ;;  %v5191_v11 = vld [vmem:[%s6496_s9 + $0xa8] sm:$0xe]  ;;  %v5141_v25 = vld [vmem:[%s6496_s9 + $0xbc] sm:$0x1] }
  0x9a   : > { %v2856_v6 = vrot.slane %v2854_v63, 4  ;;  %v2851_v17 = vsel %vm6748_vm7, %v2849_v51, %v2850_v62  ;;  %v2861_v8 = vrot.slane %v5137_v57, 5  ;;  %v2855_v23 = vsel %vm6748_vm7, %v5206_v12, %v2854_v63  ;;  %v5192_v31 = vld [vmem:[%s6496_s9 + $0xb4] sm:$0xe]  ;;  %v6285_v38 = vld [vmem:[%s6496_s9 + $0x24] sm:$0xf] }
  0x9b   : > { %v2868_v21 = vrot.slane %v5140_v2, 5  ;;  %v7029_v1 = vld [vmem:[%s6496_s9 + $0x28] sm:$0xf]  ;;  %v5222_v60 = vcombine.low %v2848_v41, %v2851_v17  ;;  %v5207_v44 = vrot.slane %v5191_v11, 9  ;;  %v2864_v59 = vrot.slane %v5138_v10, 5 }
  0x9c   : > { %v2858_v18 = vsel %vm6748_vm7, %v2856_v6, %v2857_v58  ;;  %v4954_v28 = vcombine.low %v6285_v38, %v7029_v1  ;;  %v6287_v47 = vld [vmem:[%s6496_s9 + $0x30] sm:$0xf]  ;;  %v2871_v51 = vrot.slane %v5141_v25, 5  ;;  %v5143_v62 = vld [vmem:[%s6496_s9 + $0xc4] sm:$0xf]  ;;  %v2256_v25 = vshrl.u32 %v6956_v40, 16 }
  0x9d   : > { %5803 = vmatmul.mubr.msk.bf16.gmra.mrb[16].mxu0 %vm656_vm3, %v5220_v49  ;;  %v5223_v20 = vcombine.low %v2855_v23, %v2858_v18  ;;  %v5208_v49 = vrot.slane %v5192_v31, 9  ;;  %v2870_v50 = vrot.slane %v2868_v21, 4  ;;  %v2862_v57 = vsel %vm6748_vm7, %v5207_v44, %v2861_v8  ;;  %v5193_v12 = vld [vmem:[%s6496_s9 + $0xc0] sm:$0xe]  ;;  %v6289_v41 = vld [vmem:[%s6496_s9 + $0x3c] sm:$0xf] }
  0x9e   : > { %5651 = vmatmul.mubr.msk.bf16.vlgmr.msra.gmra.mrb[0].mxu1 %vm656_vm3, %v4952_v45  ;;  %5806 = vmatprep.mubr.msk.bf16.mxu0 %vm656_vm3, %v5221_v4  ;;  %v2863_v45 = vrot.slane %v2861_v8, 4  ;;  %v2875_v63 = vrot.slane %v5143_v62, 5  ;;  %v5209_v6 = vrot.slane %v5193_v12, 9  ;;  %v7054_v17 = vld [vmem:[%s6496_s9 + $0x40] sm:$0xf]  ;;  %v4957_v18 = vcombine.low %v6661_v27, %v6664_v36  ;;  %v6241_v62 = vld [vmem:[%s6496_s9 + $0x24] sm:$0xff]  }
  0x9f   : > { %5683 = vmatpush3.bf16.msra.mxu1 %v1424_v61  ;;  %5654 = vmatprep.mubr.msk.bf16.mxu1 %vm656_vm3, %v4953_v26  ;;  %v7034_v26 = vld [vmem:[%s6496_s9 + $0x34] sm:$0xf]  ;;  %v2869_v58 = vsel %vm6748_vm7, %v5208_v49, %v2868_v21  ;;  %v2872_v54 = vsel %vm6748_vm7, %v2870_v50, %v2871_v51  ;;  %v5144_v61 = vld [vmem:[%s6496_s9 + $0xc8] sm:$0x1]  ;;  %v4956_v10 = vcombine.low %v6289_v41, %v7054_v17  ;;  %v2252_v21 = vshll.u32 %v6956_v40, 16 }
  0xa0   : > { %6181 = vmatprep.subr.msk.bf16.mxu1 %vm705_vm0, %v7008_v7  ;;  %v4955_v48 = vcombine.low %v6287_v47, %v7034_v26  ;;  %v2865_v4 = vsel %vm6748_vm7, %v2863_v45, %v2864_v59  ;;  %v5225_v11 = vcombine.low %v2869_v58, %v2872_v54  ;;  %v2877_v8 = vrot.slane %v2875_v63, 4  ;;  %v1162_v45 = vld [vmem:[%s6496_s9] sm:$0xe]  ;;  %v1163_v59 = vld [vmem:[%s6496_s9 + $0xc] sm:$0xe] }
  0xa1   : > { %v5224_v2 = vcombine.low %v2862_v57, %v2865_v4  ;;  %v2878_v23 = vrot.slane %v5144_v61, 5  ;;  %v2876_v31 = vsel %vm6748_vm7, %v5209_v6, %v2875_v63  ;;  %v7069_v27 = vrot.slane %v2252_v21, 5  ;;  %v1166_v41 = vld [vmem:[%s6496_s9 + $0x30] sm:$0xe] }
  0xa2   : > { %v2258_v36 = vrot.slane %v2256_v25, 4  ;;  %v4959_v44 = vcombine.low %v6721_v19, %v6727_v35  ;;  %v2262_v47 = vshll.u32 %v6959_v55, 16  ;;  %v4983_v19 = vrot.slane %v1162_v45, 9 }
  0xa3   : > { %v2879_v38 = vsel %vm6748_vm7, %v2877_v8, %v2878_v23  ;;  %8292 = vst [vmem:[#allocation6_spill] sm:$0xff] %v7069_v27  ;;  %v4984_v35 = vrot.slane %v1163_v59, 9  ;;  %v1229_v4 = vrot.slane %v6993_v9, 5  ;;  %v1236_v12 = vrot.slane %v7029_v1, 5  ;;  %v1167_v8 = vld [vmem:[%s6496_s9 + $0x3c] sm:$0xe] }
  0xa4   : > { %v5226_v40 = vcombine.low %v2876_v31, %v2879_v38  ;;  %v2259_v49 = vor.u32 %v2258_v36, %v7069_v27  ;;  %v7089_v51 = vrot.slane %v2262_v47, 5  ;;  %v4960_v58 = vcombine.low %v6742_v0, %v6755_v29  ;;  %v1168_v31 = vld [vmem:[%s6496_s9 + $0x48] sm:$0xe]  ;;  %v6295_v59 = vld [vmem:[%s6496_s9 + $0x38] sm:$0x1] }
  0xa5   : > { %5807 = vmatmul.mubr.msk.bf16.gmra.mrb[20].mxu0 %vm656_vm3, %v5222_v60  ;;  %v4958_v60 = vcombine.low %v6690_v24, %v6696_v37  ;;  %v6292_v24 = vld [vmem:[%s6496_s9 + $0x14] sm:$0x1]  ;;  %v4064_v54 = vsel %vm705_vm0, %v6813_v22, 0  ;;  %v4961_v61 = vcombine.low %v6774_v53, %v6781_v16  ;;  %v4962_v6 = vcombine.low %v6800_v39, %v6808_v43  ;;  %v6293_v16 = vld [vmem:[%s6496_s9 + $0x20] sm:$0x1] }
  0xa6   : > { %5655 = vmatmul.mubr.msk.bf16.gmra.mrb[4].mxu1 %vm656_vm3, %v4954_v28  ;;  %5810 = vmatprep.mubr.msk.bf16.mxu0 %vm656_vm3, %v5223_v20  ;;  %v1222_v28 = vrot.slane %v6986_v34, 5  ;;  %v6239_v20 = vld [vmem:[%s6496_s9 + $0x18] sm:$0xff]   ;;  %v6291_v34 = vld [vmem:[%s6496_s9 + $0x8] sm:$0x1]  ;;  %v1225_v37 = vrot.slane %v6292_v24, 5  ;;  %8293 = vst [vmem:[#allocation7_spill] sm:$0xff] %v7089_v51  ;;  %v4963_v9 = vcombine.low %v6832_v5, %v6844_v30 }
  0xa7   : > { %5658 = vmatprep.mubr.msk.bf16.mxu1 %vm656_vm3, %v4955_v48  ;;  %v1215_v48 = vrot.slane %v6952_v15, 5  ;;  %v1218_v50 = vrot.slane %v6291_v34, 5  ;;  %v1164_v15 = vld [vmem:[%s6496_s9 + $0x18] sm:$0xe]  ;;  %v7094_v63 = vrot.slane %v2259_v49, 4  ;;  %v1232_v22 = vrot.slane %v6293_v16, 5 }
  0xa8   : > { %v1224_v55 = vrot.slane %v1222_v28, 4  ;;  %v4985_v1 = vrot.slane %v1164_v15, 9  ;;  %v7116_v29 = vsel %vm6748_vm7, %v4984_v35, %v1222_v28  ;;  %v1238_v25 = vrot.slane %v1236_v12, 4  ;;  %v5308_v24 = vld [vmem:[%s6496_s9 + $0x18] sm:$0xf] }
  0xa9   : > { %v1217_v57 = vrot.slane %v1215_v48, 4  ;;  %8294 = vst [vmem:[#allocation8_spill] sm:$0xff] %v7094_v63  ;;  %v7112_v0 = vsel %vm6748_vm7, %v4983_v19, %v1215_v48  ;;  %v1246_v47 = vrot.slane %v6295_v59, 5  ;;  %v7153_v49 = vsel %vm705_vm0, %v7008_v7, 0  ;;  %v5309_v7 = vld [vmem:[%s6496_s9 + $0x1c] sm:$0xf] }
  0xaa   : > { %v7120_v53 = vsel %vm6748_vm7, %v1224_v55, %v1225_v37  ;;  %v7157_v34 = vsel %vm6748_vm7, %v4985_v1, %v1229_v4  ;;  %v6245_v37 = vld [vmem:[%s6496_s9 + $0x3c] sm:$0xff]   ;;  %v4988_v35 = vrot.slane %v1167_v8, 9  ;;  %v6296_v55 = vld [vmem:[%s6496_s9 + $0x44] sm:$0x1]  ;;  %v3585_v8 = vshll.u32 %v5308_v24, 16 }
  0xab   : > { %v7131_v23 = vsel %vm6748_vm7, %v1217_v57, %v1218_v50  ;;  %v1169_v50 = vld [vmem:[%s6496_s9 + $0x54] sm:$0xe]  ;;  %v1253_v15 = vrot.slane %v6296_v55, 5  ;;  %v5312_v39 = vld [vmem:[%s6496_s9 + $0x28] sm:$0xf] }
  0xac   : > { %v6303_v5 = vld [vmem:[%s6496_s9 + $0x70] sm:$0xf] }
  0xad   : > { %5811 = vmatmul.mubr.msk.bf16.gmra.mrb[24].mxu0 %vm656_vm3, %v5224_v2  ;;  %v1165_v2 = vld [vmem:[%s6496_s9 + $0x24] sm:$0xe]  ;;  %v1278_v30 = vrot.slane %v6303_v5, 5 }
  0xae   : > { %5659 = vmatmul.mubr.msk.bf16.gmra.mrb[8].mxu1 %vm656_vm3, %v4956_v10  ;;  %5814 = vmatprep.mubr.msk.bf16.mxu0 %vm656_vm3, %v5225_v11  ;;  %v1243_v10 = vrot.slane %v7034_v26, 5  ;;  %v6243_v11 = vld [vmem:[%s6496_s9 + $0x30] sm:$0xff]   ;;  %v7127_v26 = vld [vmem:[%s8269_s1 + $0x20] sm:$0xf]  ;;  %v4986_v21 = vrot.slane %v1165_v2, 9 }
  0xaf   : > { %5662 = vmatprep.mubr.msk.bf16.mxu1 %vm656_vm3, %v4957_v18  ;;  %v1231_v18 = vrot.slane %v1229_v4, 4  ;;  %v1280_v48 = vrot.slane %v1278_v30, 4 }
  0xb0   : > { %v1245_v45 = vrot.slane %v1243_v10, 4  ;;  %v7164_v19 = vsel %vm6748_vm7, %v4986_v21, %v1236_v12  ;;  %v3595_v21 = vshrl.u32 %v5309_v7, 16 }
  0xb1   : > { %v7173_v4 = vsel %vm6748_vm7, %v1231_v18, %v1232_v22  ;;  %v3582_v22 = vshrl.u32 %v5308_v24, 16  ;;  %v3591_v18 = vshll.u32 %v5309_v7, 16  ;;  %v5311_v24 = vld [vmem:[%s6496_s9 + $0x24] sm:$0xf] }
  0xb2   : > { %v7186_v1 = vsel %vm6748_vm7, %v1245_v45, %v1246_v47 }
  0xb3   : > { %v3584_v43 = vrot.slane %v3582_v22, 4  ;;  %v7228_v7 = vrot.slane %v3591_v18, 5  ;;  %v3609_v22 = vshll.u32 %v5311_v24, 16  ;;  %v3619_v18 = vshrl.u32 %v5312_v39, 16 }
  0xb5   : > { %5815 = vmatmul.mubr.msk.bf16.gmra.mrb[28].mxu0 %vm656_vm3, %v5226_v40  ;;  %v6294_v40 = vld [vmem:[%s6496_s9 + $0x2c] sm:$0x1]  ;;  %v3611_v27 = vrot.slane %v3609_v22, 5 }
  0xb6   : > { %5663 = vmatmul.mubr.msk.bf16.gmra.mrb[12].mxu1 %vm656_vm3, %v4958_v60  ;;  %5820 = vmatprep.mubr.msk.bf16.mxu0 %vm656_vm3, %v6239_v20  ;;  %v1239_v28 = vrot.slane %v6294_v40, 5  ;;  %v1250_v60 = vrot.slane %v7054_v17, 5  ;;  %v6299_v40 = vld [vmem:[%s6496_s9 + $0x50] sm:$0x1]  ;;  %v6304_v17 = vld [vmem:[%s6496_s9 + $0x74] sm:$0x1] }
  0xb7   : > { %5666 = vmatprep.mubr.msk.bf16.mxu1 %vm656_vm3, %v4959_v44  ;;  %v4987_v44 = vrot.slane %v1166_v41, 9  ;;  %v4990_v41 = vrot.slane %v1169_v50, 9  ;;  %v1170_v50 = vld [vmem:[%s6496_s9 + $0x60] sm:$0xe]  ;;  %v5313_v20 = vld [vmem:[%s6496_s9 + $0x2c] sm:$0x1] }
  0xb8   : > { %v1252_v12 = vrot.slane %v1250_v60, 4  ;;  %v7199_v45 = vsel %vm6748_vm7, %v4988_v35, %v1250_v60  ;;  %v6300_v35 = vld [vmem:[%s6496_s9 + $0x5c] sm:$0x1] }
  0xb9   : > { %v7182_v2 = vsel %vm6748_vm7, %v4987_v44, %v1243_v10  ;;  %v1267_v55 = vrot.slane %v6300_v35, 5  ;;  %v1171_v35 = vld [vmem:[%s6496_s9 + $0x6c] sm:$0xe] }
  0xba   : > { %v7203_v59 = vsel %vm6748_vm7, %v1252_v12, %v1253_v15  ;;  %v6301_v15 = vld [vmem:[%s6496_s9 + $0x64] sm:$0xf]  ;;  %v3597_v12 = vrot.slane %v3595_v21, 4  ;;  %v4992_v5 = vrot.slane %v1171_v35, 9 }
  0xbb   : > { %v6251_v21 = vld [vmem:[%s6496_s9 + $0x60] sm:$0xff]  }
  0xbd   : > { %5821 = vmatmul.mubr.msk.bf16.vlgmr.msra.gmra.mrb[0].mxu0 %vm656_vm3, %v6241_v62  ;;  %v6297_v62 = vld [vmem:[%s6496_s9 + $0x4c] sm:$0xf] }
  0xbe   : > { %5667 = vmatmul.mubr.msk.bf16.gmra.mrb[16].mxu1 %vm656_vm3, %v4960_v58  ;;  %5853 = vmatpush3.bf16.msra.mxu0 %v4064_v54  ;;  %v1257_v57 = vrot.slane %v6297_v62, 5  ;;  %v7177_v58 = vsel %vm6748_vm7, %v1238_v25, %v1239_v28  ;;  %v4989_v54 = vrot.slane %v1168_v31, 9  ;;  %v1260_v28 = vrot.slane %v6299_v40, 5 }
  0xbf   : > { %5670 = vmatprep.mubr.msk.bf16.mxu1 %vm656_vm3, %v4961_v61  ;;  %5824 = vmatprep.mubr.msk.bf16.mxu0 %vm656_vm3, %v6243_v11  ;;  %v6247_v61 = vld [vmem:[%s6496_s9 + $0x48] sm:$0xff]   ;;  %v6298_v11 = vld [vmem:[%s6496_s9 + $0x58] sm:$0xf]  ;;  %v1271_v62 = vrot.slane %v6301_v15, 5  ;;  %v5315_v15 = vld [vmem:[%s6496_s9 + $0x34] sm:$0xf] }
  0xc0   : > { %6187 = vmatprep.subr.msk.bf16.mxu0 %vm705_vm0, %v7127_v26  ;;  %v1264_v16 = vrot.slane %v6298_v11, 5  ;;  %v1259_v31 = vrot.slane %v1257_v57, 4  ;;  %v7207_v47 = vsel %vm6748_vm7, %v4989_v54, %v1257_v57  ;;  %v5310_v57 = vld [vmem:[%s6496_s9 + $0x20] sm:$0x1]  ;;  %v5314_v54 = vld [vmem:[%s6496_s9 + $0x30] sm:$0xf] }
  0xc1   : > { %v4991_v11 = vrot.slane %v1170_v50, 9  ;;  %v3633_v50 = vshll.u32 %v5314_v54, 16  ;;  %v3601_v25 = vshll.u32 %v5310_v57, 16  ;;  %v3639_v36 = vshll.u32 %v5315_v15, 16 }
  0xc2   : > { %v7218_v60 = vsel %vm6748_vm7, %v4990_v41, %v1264_v16  ;;  %v7234_v41 = vsel %vm6748_vm7, %v1259_v31, %v1260_v28  ;;  %v1273_v31 = vrot.slane %v1271_v62, 4  ;;  %v3630_v28 = vshrl.u32 %v5314_v54, 16 }
  0xc3   : > { %v7276_v35 = vrot.slane %v3639_v36, 5 }
  0xc5   : > { %5825 = vmatmul.mubr.msk.bf16.gmra.mrb[4].mxu0 %vm656_vm3, %v6245_v37  ;;  %v1266_v37 = vrot.slane %v1264_v16, 4  ;;  %v6302_v16 = vld [vmem:[%s6496_s9 + $0x68] sm:$0x1] }
  0xc6   : > { %5671 = vmatmul.mubr.msk.bf16.gmra.mrb[20].mxu1 %vm656_vm3, %v4962_v6  ;;  %5828 = vmatprep.mubr.msk.bf16.mxu0 %vm656_vm3, %v6247_v61  ;;  %v3587_v6 = vrot.slane %v3585_v8, 5  ;;  %v6249_v61 = vld [vmem:[%s6496_s9 + $0x54] sm:$0xff]   ;;  %v1274_v40 = vrot.slane %v6302_v16, 5  ;;  %v3615_v8 = vshll.u32 %v5312_v39, 16  ;;  %v3598_v16 = vor.u32 %v3597_v12, %v7228_v7 }
  0xc7   : > { %5674 = vmatprep.mubr.msk.bf16.mxu1 %vm656_vm3, %v4963_v9  ;;  %v3606_v9 = vshrl.u32 %v5311_v24, 16  ;;  %v7243_v44 = vsel %vm6748_vm7, %v1266_v37, %v1267_v55  ;;  %v1281_v24 = vrot.slane %v6304_v17, 5  ;;  %v3643_v39 = vshrl.u32 %v5315_v15, 16 }
  0xc8   : > { %v3588_v10 = vor.u32 %v3587_v6, %v3584_v43  ;;  %v7249_v37 = vrot.slane %v3615_v8, 5  ;;  %v3621_v55 = vrot.slane %v3619_v18, 4  ;;  %v8295_v43 = vcombine.low %v6853_v52, %v6864_v46  ;;  %v6305_v8 = vld [vmem:[%s6496_s9 + $0x7c] sm:$0xf]  ;;  %v7285_v18 = vld [vmem:[%s6496_s9 + $0x38] sm:$0x1] }
  0xc9   : > { %v3608_v38 = vrot.slane %v3606_v9, 4  ;;  %v7258_v17 = vsel %vm6748_vm7, %v4991_v11, %v1271_v62  ;;  %v7262_v57 = vsel %vm6748_vm7, %v1273_v31, %v1274_v40  ;;  %v3632_v6 = vrot.slane %v3630_v28, 4  ;;  %8297 = vst [vmem:[#allocation9_spill] sm:$0xff] %v7285_v18 }
  0xca   : > { %v3635_v12 = vrot.slane %v3633_v50, 5  ;;  %v8296_v52 = vcombine.low %v6885_v33, %v6890_v56  ;;  %v3589_v46 = vrot.slane %v3588_v10, 4  ;;  %v3599_v54 = vrot.slane %v3598_v16, 4  ;;  %v6253_v33 = vld [vmem:[%s6496_s9 + $0x6c] sm:$0xff]   ;;  %v1173_v16 = vld [vmem:[%s6496_s9 + $0x84] sm:$0xe] }
  0xcb   : > { %v3625_v62 = vshll.u32 %v5313_v20, 16  ;;  %v7270_v11 = vsel %vm6748_vm7, %v4992_v5, %v1278_v30  ;;  %v7274_v40 = vsel %vm6748_vm7, %v1280_v48, %v1281_v24  ;;  %v3645_v9 = vrot.slane %v3643_v39, 4  ;;  %v6254_v48 = vld [vmem:[%s6496_s9 + $0x78] sm:$0xff]  }
  0xcc   : > { %v3612_v10 = vor.u32 %v3611_v27, %v3608_v38  ;;  %v3622_v20 = vor.u32 %v3621_v55, %v7249_v37  ;;  %v1285_v30 = vrot.slane %v6305_v8, 5  ;;  %v3636_v38 = vor.u32 %v3635_v12, %v3632_v6  ;;  %v5317_v5 = vld [vmem:[%s6496_s9 + $0x3c] sm:$0xf] }
  0xcd   : > { %5829 = vmatmul.mubr.msk.bf16.gmra.mrb[8].mxu0 %vm656_vm3, %v6249_v61  ;;  %v3603_v61 = vrot.slane %v3601_v25, 5  ;;  %v1172_v25 = vld [vmem:[%s6496_s9 + $0x78] sm:$0xe]  ;;  %v7301_v50 = vrot.slane %v3625_v62, 5  ;;  %v3646_v39 = vor.u32 %v3645_v9, %v7276_v35  ;;  %v3649_v55 = vshll.u32 %v7285_v18, 16 }
  0xce   : > { %5675 = vmatmul.mubr.msk.bf16.gmra.mrb[24].mxu1 %vm656_vm3, %v8295_v43  ;;  %5832 = vmatprep.mubr.msk.bf16.mxu0 %vm656_vm3, %v6251_v21  ;;  %v3594_v21 = vsel %vm6522_vm4, %v3589_v46, %v7228_v7  ;;  %v4993_v24 = vrot.slane %v1172_v25, 9  ;;  %v6306_v43 = vld [vmem:[%s6496_s9 + $0x88] sm:$0xf]  ;;  %v7309_v7 = vld [vmem:[%s6496_s9 + $0x40] sm:$0xf]  ;;  %v3613_v12 = vrot.slane %v3612_v10, 4  ;;  %v8299_v62 = vcombine.low %v6905_v14, %v6914_v42 }
  0xcf   : > { %5678 = vmatprep.mubr.msk.bf16.mxu1 %vm656_vm3, %v8296_v52  ;;  %v3604_v31 = vsel %vm6522_vm4, %v3599_v54, %v3603_v61  ;;  %v1292_v6 = vrot.slane %v6306_v43, 5  ;;  %8298 = vst [vmem:[#allocation10_spill] sm:$0xff] %v7309_v7  ;;  %v3623_v52 = vrot.slane %v3622_v20, 4  ;;  %v1287_v46 = vrot.slane %v1285_v30, 4  ;;  %v6307_v54 = vld [vmem:[%s6496_s9 + $0x80] sm:$0x1] }
  0xd0   : > { %v1288_v61 = vrot.slane %v6307_v54, 5  ;;  %v3637_v9 = vrot.slane %v3636_v38, 4  ;;  %v4994_v25 = vrot.slane %v1173_v16, 9  ;;  %v3654_v8 = vshrl.u32 %v5317_v5, 16  ;;  %v6255_v10 = vld [vmem:[%s6496_s9 + $0x84] sm:$0xff]  }
  0xd1   : > { %v3657_v43 = vshll.u32 %v5317_v5, 16  ;;  %v7323_v20 = vcombine.low %v3594_v21, %v3604_v31  ;;  %v7327_v14 = vsel %vm705_vm0, %v7127_v26, 0  ;;  %v3667_v38 = vshrl.u32 %v7309_v7, 16  ;;  %v6256_v21 = vld [vmem:[%s6496_s9 + $0x90] sm:$0xff]   ;;  %v6312_v18 = vld [vmem:[%s6496_s9 + $0xa0] sm:$0xf] }
  0xd2   : > { %v3647_v16 = vrot.slane %v3646_v39, 4  ;;  %v3651_v5 = vrot.slane %v3649_v55, 5  ;;  %v1294_v54 = vrot.slane %v1292_v6, 4  ;;  %v3618_v31 = vsel %vm6522_vm4, %v3613_v12, %v7249_v37 }
  0xd3   : > { %v3628_v26 = vsel %vm6522_vm4, %v3623_v52, %v7301_v50  ;;  %v7342_v39 = vsel %vm6748_vm7, %v4993_v24, %v1285_v30  ;;  %v7346_v55 = vsel %vm6748_vm7, %v1287_v46, %v1288_v61  ;;  %v3642_v37 = vsel %vm6522_vm4, %v3637_v9, %v7276_v35  ;;  %v5323_v30 = vld [vmem:[%s6496_s9 + $0x54] sm:$0xf]  ;;  %v7363_v24 = vld [vmem:[%s6496_s9 + $0x58] sm:$0xf]  ;;  %v7368_v61 = vld [vmem:[%s6496_s9 + $0x90] sm:$0xe] }
  0xd4   : > { %v7359_v12 = vsel %vm6748_vm7, %v4994_v25, %v1292_v6  ;;  %v3656_v50 = vrot.slane %v3654_v8, 4  ;;  %v3659_v52 = vrot.slane %v3657_v43, 5  ;;  %v3669_v46 = vrot.slane %v3667_v38, 4 }
  0xd5   : > { %5833 = vmatmul.mubr.msk.bf16.gmra.mrb[12].mxu0 %vm656_vm3, %v6253_v33  ;;  %v8300_v33 = vcombine.low %v7112_v0, %v7131_v23  ;;  %v6308_v0 = vld [vmem:[%s6496_s9 + $0x8c] sm:$0x1]  ;;  %v3652_v36 = vsel %vm6522_vm4, %v3647_v16, %v3651_v5  ;;  %v3702_v25 = vshrl.u32 %v5323_v30, 16  ;;  %v3705_v8 = vshll.u32 %v5323_v30, 16 }
  0xd6   : > { %5679 = vmatmul.mubr.msk.bf16.gmra.mrb[28].mxu1 %vm656_vm3, %v8299_v62  ;;  %5836 = vmatprep.mubr.msk.bf16.mxu0 %vm656_vm3, %v6254_v48  ;;  %v3663_v48 = vshll.u32 %v7309_v7, 16  ;;  %v1295_v23 = vrot.slane %v6308_v0, 5  ;;  %v5320_v62 = vld [vmem:[%s6496_s9 + $0x48] sm:$0xf]  ;;  %v7352_v0 = vld [vmem:[%s6496_s9 + $0x4c] sm:$0xf]  ;;  %v8302_v38 = vcombine.low %v7116_v29, %v7120_v53  ;;  %v7386_v16 = vcombine.low %v3618_v31, %v3628_v26 }
  0xd7   : > { %5684 = vmatprep.mubr.msk.bf16.mxu1 %vm656_vm3, %v8300_v33  ;;  %v7349_v33 = vld [vmem:[%s6496_s9 + $0x44] sm:$0x1]  ;;  %v3678_v27 = vshrl.u32 %v5320_v62, 16  ;;  %v3681_v15 = vshll.u32 %v5320_v62, 16  ;;  %v3687_v6 = vshll.u32 %v7352_v0, 16  ;;  %v3691_v9 = vshrl.u32 %v7352_v0, 16 }
  0xd8   : > { %8301 = vst [vmem:[#allocation11_spill] sm:$0xff] %v7349_v33  ;;  %v7365_v28 = vrot.slane %v3663_v48, 5  ;;  %v7374_v35 = vsel %vm6748_vm7, %v1294_v54, %v1295_v23  ;;  %v3711_v43 = vshll.u32 %v7363_v24, 16  ;;  %v3715_v48 = vshrl.u32 %v7363_v24, 16  ;;  %v5326_v31 = vld [vmem:[%s6496_s9 + $0x60] sm:$0xf] }
  0xd9   : > { %v3673_v5 = vshll.u32 %v7349_v33, 16  ;;  %v4995_v54 = vrot.slane %v7368_v61, 9  ;;  %v8303_v23 = vcombine.low %v7157_v34, %v7173_v4  ;;  %v7397_v29 = vcombine.low %v3642_v37, %v3652_v36  ;;  %v6257_v26 = vld [vmem:[%s6496_s9 + $0x9c] sm:$0xff]   ;;  %v6258_v30 = vld [vmem:[%s6496_s9 + $0xa8] sm:$0xff]   ;;  %v6309_v36 = vld [vmem:[%s8269_s1 + $0x10] sm:$0xf] }
  0xda   : > { %v3660_v53 = vor.u32 %v3659_v52, %v3656_v50  ;;  %v3680_v62 = vrot.slane %v3678_v27, 4  ;;  %v7408_v34 = vrot.slane %v3687_v6, 5  ;;  %v3693_v4 = vrot.slane %v3691_v9, 4  ;;  %v6310_v6 = vld [vmem:[%s6496_s9 + $0x94] sm:$0xf] }
  0xdb   : > { %v3704_v27 = vrot.slane %v3702_v25, 4  ;;  %v3707_v37 = vrot.slane %v3705_v8, 5  ;;  %v7417_v50 = vrot.slane %v3711_v43, 5  ;;  %v3717_v52 = vrot.slane %v3715_v48, 4  ;;  %v7423_v9 = vld [vmem:[%s6496_s9 + $0x64] sm:$0xf] }
  0xdc   : > { %8304 = vst [vmem:[#allocation12_spill] sm:$0xff] %v7423_v9  ;;  %v3726_v61 = vshrl.u32 %v5326_v31, 16  ;;  %v7425_v22 = vrot.slane %v3660_v53, 4  ;;  %v1306_v25 = vrot.slane %v6312_v18, 5  ;;  %v3694_v43 = vor.u32 %v3693_v4, %v7408_v34 }
  0xdd   : > { %5837 = vmatmul.mubr.msk.bf16.gmra.mrb[16].mxu0 %vm656_vm3, %v6255_v10  ;;  %v3729_v10 = vshll.u32 %v5326_v31, 16  ;;  %v3708_v31 = vor.u32 %v3707_v37, %v3704_v27  ;;  %v3718_v53 = vor.u32 %v3717_v52, %v7417_v50  ;;  %v8305_v18 = vcombine.low %v7164_v19, %v7177_v58  ;;  %v6259_v37 = vld [vmem:[%s6496_s9 + $0xb4] sm:$0xff]  }
  0xde   : > { %5685 = vmatmul.mubr.msk.bf16.vlgmr.msra.gmra.mrb[0].mxu1 %vm656_vm3, %v8302_v38  ;;  %5840 = vmatprep.mubr.msk.bf16.mxu0 %vm656_vm3, %v6256_v21  ;;  %v3683_v21 = vrot.slane %v3681_v15, 5  ;;  %v7406_v38 = vld [vmem:[%s6496_s9 + $0x50] sm:$0x1]  ;;  %v7415_v15 = vld [vmem:[%s6496_s9 + $0x5c] sm:$0x1]  ;;  %v8306_v27 = vcombine.low %v7182_v2, %v7186_v1  ;;  %v1308_v52 = vrot.slane %v1306_v25, 4 }
  0xdf   : > { %5717 = vmatpush3.bf16.msra.mxu1 %v7153_v49  ;;  %5688 = vmatprep.mubr.msk.bf16.mxu1 %vm656_vm3, %v8303_v23  ;;  %v3670_v49 = vor.u32 %v3669_v46, %v7365_v28  ;;  %v7419_v46 = vrot.slane %v3673_v5, 5  ;;  %v1299_v23 = vrot.slane %v6310_v6, 5  ;;  %v3697_v48 = vshll.u32 %v7406_v38, 16  ;;  %v1175_v5 = vld [vmem:[%s6496_s9 + $0x9c] sm:$0xe] }
  0xe0   : > { %6183 = vmatprep.subr.msk.bf16.mxu1 %vm705_vm0, %v6309_v36  ;;  %v6311_v36 = vld [vmem:[%s6496_s9 + $0x98] sm:$0x1]  ;;  %v3684_v7 = vor.u32 %v3683_v21, %v3680_v62  ;;  %v3721_v6 = vshll.u32 %v7415_v15, 16  ;;  %v3739_v62 = vshrl.u32 %v7423_v9, 16  ;;  %v3731_v4 = vrot.slane %v3729_v10, 5 }
  0xe1   : > { %v1302_v33 = vrot.slane %v6311_v36, 5  ;;  %v3671_v8 = vrot.slane %v3670_v49, 4  ;;  %v3735_v36 = vshll.u32 %v7423_v9, 16  ;;  %v7444_v21 = vsel %vm6748_vm7, %v4995_v54, %v1299_v23  ;;  %v7455_v2 = vld [vmem:[%s6496_s9 + $0x68] sm:$0x1] }
  0xe2   : > { %v3728_v49 = vrot.slane %v3726_v61, 4  ;;  %v3685_v19 = vrot.slane %v3684_v7, 4  ;;  %v4996_v58 = vrot.slane %v1175_v5, 9  ;;  %v3695_v3 = vrot.slane %v3694_v43, 4  ;;  %8307 = vst [vmem:[#allocation13_spill] sm:$0xff] %v7455_v2  ;;  %v6260_v5 = vld [vmem:[%s6496_s9 + $0xc0] sm:$0xff]  }
  0xe3   : > { %v3699_v54 = vrot.slane %v3697_v48, 5  ;;  %v3723_v63 = vrot.slane %v3721_v6, 5  ;;  %v1313_v61 = vrot.slane %v6890_v56, 5  ;;  %v3709_v10 = vrot.slane %v3708_v31, 4  ;;  %v1177_v31 = vld [vmem:[%s6496_s9 + $0xb4] sm:$0xe] }
  0xe4   : > { %v3719_v51 = vrot.slane %v3718_v53, 4  ;;  %v7457_v1 = vrot.slane %v3735_v36, 5  ;;  %v3741_v7 = vrot.slane %v3739_v62, 4  ;;  %v3666_v43 = vsel %vm6522_vm4, %v7425_v22, %v7365_v28  ;;  %v6314_v62 = vld [vmem:[%s6496_s9 + $0xb0] sm:$0x1] }
  0xe5   : > { %5841 = vmatmul.mubr.msk.bf16.gmra.mrb[20].mxu0 %vm656_vm3, %v6257_v26  ;;  %v1301_v26 = vrot.slane %v1299_v23, 4  ;;  %v1176_v23 = vld [vmem:[%s6496_s9 + $0xa8] sm:$0xe]  ;;  %v3676_v48 = vsel %vm6522_vm4, %v3671_v8, %v7419_v46  ;;  %v3732_v6 = vor.u32 %v3731_v4, %v3728_v49  ;;  %v3690_v53 = vsel %vm6522_vm4, %v3685_v19, %v7408_v34  ;;  %v5329_v46 = vld [vmem:[%s6496_s9 + $0x6c] sm:$0xf] }
  0xe6   : > { %5689 = vmatmul.mubr.msk.bf16.gmra.mrb[4].mxu1 %vm656_vm3, %v8305_v18  ;;  %5844 = vmatprep.mubr.msk.bf16.mxu0 %vm656_vm3, %v6258_v30  ;;  %v6313_v18 = vld [vmem:[%s6496_s9 + $0xa4] sm:$0x1]  ;;  %v7477_v36 = vsel %vm6748_vm7, %v4996_v58, %v1306_v25  ;;  %v4997_v28 = vrot.slane %v1176_v23, 9  ;;  %v1315_v8 = vrot.slane %v1313_v61, 4  ;;  %v3745_v49 = vshll.u32 %v7455_v2, 16 }
  0xe7   : > { %5692 = vmatprep.mubr.msk.bf16.mxu1 %vm656_vm3, %v8306_v27  ;;  %v1309_v30 = vrot.slane %v6313_v18, 5  ;;  %v7469_v56 = vsel %vm6748_vm7, %v1301_v26, %v1302_v33  ;;  %v3700_v33 = vsel %vm6522_vm4, %v3695_v3, %v3699_v54  ;;  %v1316_v26 = vrot.slane %v6314_v62, 5  ;;  %v5332_v18 = vld [vmem:[%s6496_s9 + $0x78] sm:$0xf]  ;;  %v7532_v54 = vld [vmem:[%s6496_s9 + $0xbc] sm:$0x1] }
  0xe8   : > { %v3714_v34 = vsel %vm6522_vm4, %v3709_v10, %v7417_v50  ;;  %v3724_v25 = vsel %vm6522_vm4, %v3719_v51, %v3723_v63  ;;  %v3742_v4 = vor.u32 %v3741_v7, %v7457_v1  ;;  %v4998_v27 = vrot.slane %v1177_v31, 9  ;;  %v7506_v51 = vld [vmem:[%s6496_s9 + $0x70] sm:$0xf]  ;;  %v7536_v10 = vld [vmem:[%s6496_s9 + $0x7c] sm:$0xf] }
  0xe9   : > { %v7481_v22 = vsel %vm6748_vm7, %v1308_v52, %v1309_v30  ;;  %v8309_v3 = vcombine.low %v7199_v45, %v7203_v59  ;;  %v7502_v19 = vrot.slane %v3732_v6, 4  ;;  %v1320_v50 = vrot.slane %v6914_v42, 5  ;;  %8310 = vst [vmem:[#allocation15_spill] sm:$0xff] %v7506_v51  ;;  %8312 = vst [vmem:[#allocation16_spill] sm:$0xff] %v7536_v10  ;;  %v5335_v7 = vld [vmem:[%s6496_s9 + $0x84] sm:$0xf] }
  0xea   : > { %8308 = vst [vmem:[#allocation14_spill] sm:$0xff] %v7481_v22  ;;  %v3750_v63 = vshrl.u32 %v5329_v46, 16  ;;  %v8311_v45 = vcombine.low %v7207_v47, %v7234_v41  ;;  %v7514_v58 = vcombine.low %v3690_v53, %v3700_v33  ;;  %v7520_v42 = vsel %vm6748_vm7, %v4997_v28, %v1313_v61  ;;  %v6261_v61 = vld [vmem:[%s6496_s9 + $0xcc] sm:$0xff]   ;;  %v7548_v31 = vld [vmem:[%s6496_s9 + $0x88] sm:$0xf] }
  0xeb   : > { %v7523_v30 = vcombine.low %v3714_v34, %v3724_v25  ;;  %v7527_v47 = vsel %vm6748_vm7, %v1315_v8, %v1316_v26  ;;  %v7529_v41 = vrot.slane %v3745_v49, 5  ;;  %v3759_v6 = vshll.u32 %v7506_v51, 16  ;;  %8313 = vst [vmem:[#allocation17_spill] sm:$0xff] %v7548_v31  ;;  %v5338_v62 = vld [vmem:[%s6496_s9 + $0x90] sm:$0xf] }
  0xec   : > { %v7554_v28 = vrot.slane %v1320_v50, 4  ;;  %v7556_v33 = vrot.slane %v3750_v63, 4  ;;  %v3763_v8 = vshrl.u32 %v7506_v51, 16  ;;  %v3774_v26 = vshrl.u32 %v5332_v18, 16  ;;  %v7563_v25 = vld [vmem:[%s6496_s9 + $0x94] sm:$0xf] }
  0xed   : > { %5845 = vmatmul.mubr.msk.bf16.gmra.mrb[24].mxu0 %vm656_vm3, %v6259_v37  ;;  %v7500_v37 = vcombine.low %v3666_v43, %v3676_v48  ;;  %v7544_v43 = vsel %vm6748_vm7, %v4998_v27, %v1320_v50  ;;  %v3753_v48 = vshll.u32 %v5329_v46, 16  ;;  %v3777_v49 = vshll.u32 %v5332_v18, 16  ;;  %8314 = vst [vmem:[#allocation18_spill] sm:$0xff] %v7563_v25  ;;  %v7601_v2 = vld [vmem:[%s6496_s9 + $0x8c] sm:$0x1] }
  0xee   : > { %5693 = vmatmul.mubr.msk.bf16.gmra.mrb[8].mxu1 %vm656_vm3, %v8309_v3  ;;  %5848 = vmatprep.mubr.msk.bf16.mxu0 %vm656_vm3, %v6260_v5  ;;  %v7540_v5 = vrot.slane %v3742_v4, 4  ;;  %v3783_v46 = vshll.u32 %v7536_v10, 16  ;;  %v3787_v34 = vshrl.u32 %v7536_v10, 16  ;;  %v3798_v4 = vshrl.u32 %v5335_v7, 16 }
  0xef   : > { %5696 = vmatprep.mubr.msk.bf16.mxu1 %vm656_vm3, %v8311_v45  ;;  %v3801_v27 = vshll.u32 %v5335_v7, 16  ;;  %v3807_v3 = vshll.u32 %v7548_v31, 16  ;;  %v3811_v50 = vshrl.u32 %v7548_v31, 16  ;;  %v7573_v45 = vld [vmem:[%s6496_s9 + $0x74] sm:$0x1]  ;;  %v3755_v18 = vrot.slane %v3753_v48, 5 }
  0xf0   : > { %v3822_v52 = vshrl.u32 %v5338_v62, 16  ;;  %v3825_v53 = vshll.u32 %v5338_v62, 16  ;;  %v8315_v7 = vcombine.low %v7218_v60, %v7243_v44  ;;  %v3765_v59 = vrot.slane %v3763_v8, 4  ;;  %v5341_v48 = vld [vmem:[%s6496_s9 + $0x9c] sm:$0xf] }
  0xf1   : > { %v3831_v63 = vshll.u32 %v7563_v25, 16  ;;  %v3835_v23 = vshrl.u32 %v7563_v25, 16  ;;  %v8316_v62 = vcombine.low %v7258_v17, %v7262_v57  ;;  %v7591_v44 = vld [vmem:[%s6496_s9 + $0x80] sm:$0x1]  ;;  %v3776_v60 = vrot.slane %v3774_v26, 4 }
  0xf2   : > { %8317 = vst [vmem:[#allocation19_spill] sm:$0xff] %v7591_v44  ;;  %v3800_v31 = vrot.slane %v3798_v4, 4  ;;  %v3803_v8 = vrot.slane %v3801_v27, 5  ;;  %v7595_v10 = vrot.slane %v3807_v3, 5  ;;  %v3813_v51 = vrot.slane %v3811_v50, 4 }
  0xf3   : > { %v7598_v25 = vld [vmem:[%s6496_s9 + $0xa0] sm:$0xf]  ;;  %v3824_v17 = vrot.slane %v3822_v52, 4  ;;  %v3827_v57 = vrot.slane %v3825_v53, 5  ;;  %v3849_v9 = vshll.u32 %v5341_v48, 16  ;;  %v3756_v26 = vor.u32 %v3755_v18, %v7556_v33 }
  0xf4   : > { %v3793_v27 = vshll.u32 %v7591_v44, 16  ;;  %v7610_v3 = vld [vmem:[%s6496_s9 + $0x98] sm:$0x1]  ;;  %v3855_v50 = vshll.u32 %v7598_v25, 16  ;;  %v3859_v52 = vshrl.u32 %v7598_v25, 16  ;;  %v3804_v22 = vor.u32 %v3803_v8, %v3800_v31 }
  0xf5   : > { %5849 = vmatmul.mubr.msk.bf16.gmra.mrb[28].mxu0 %vm656_vm3, %v6261_v61  ;;  %v7581_v61 = vrot.slane %v3759_v6, 5  ;;  %v3789_v6 = vrot.slane %v3787_v34, 4  ;;  %v3837_v34 = vrot.slane %v3835_v23, 4  ;;  %v3817_v33 = vshll.u32 %v7601_v2, 16 }
  0xf6   : > { %5697 = vmatmul.mubr.msk.bf16.gmra.mrb[12].mxu1 %vm656_vm3, %v8315_v7  ;;  %5854 = vmatprep.mubr.msk.bf16.mxu0 %vm656_vm3, %v7323_v20  ;;  %v3779_v7 = vrot.slane %v3777_v49, 5  ;;  %v7593_v20 = vrot.slane %v3783_v46, 5  ;;  %v3769_v49 = vshll.u32 %v7573_v45, 16  ;;  %v7605_v46 = vrot.slane %v3831_v63, 5 }
  0xf7   : > { %5700 = vmatprep.mubr.msk.bf16.mxu1 %vm656_vm3, %v8316_v62  ;;  %v3846_v62 = vshrl.u32 %v5341_v48, 16  ;;  %v3766_v4 = vor.u32 %v3765_v59, %v7581_v61  ;;  %v3814_v23 = vor.u32 %v3813_v51, %v7595_v10  ;;  %v3828_v59 = vor.u32 %v3827_v57, %v3824_v17  ;;  %v7643_v57 = vld [vmem:[%s6496_s9 + $0xa4] sm:$0x1] }
  0xf8   : > { %v3780_v53 = vor.u32 %v3779_v7, %v3776_v60  ;;  %v3790_v48 = vor.u32 %v3789_v6, %v7593_v20  ;;  %v3851_v18 = vrot.slane %v3849_v9, 5  ;;  %v8318_v44 = vcombine.low %v7270_v11, %v7274_v40 }
  0xf9   : > { %v3848_v63 = vrot.slane %v3846_v62, 4  ;;  %v8319_v31 = vrot.slane %v7532_v54, 5  ;;  %v3771_v51 = vrot.slane %v3769_v49, 5  ;;  %v3838_v60 = vor.u32 %v3837_v34, %v7605_v46  ;;  %v7646_v34 = vld [vmem:[%s6496_s9 + $0xac] sm:$0xf] }
  0xfa   : > { %v3841_v9 = vshll.u32 %v7610_v3, 16  ;;  %v8320_v11 = vcombine.low %v7342_v39, %v7346_v55  ;;  %v3757_v40 = vrot.slane %v3756_v26, 4  ;;  %v7639_v54 = vrot.slane %v3855_v50, 5 }
  0xfb   : > { %v3781_v7 = vrot.slane %v3780_v53, 4  ;;  %v3791_v6 = vrot.slane %v3790_v48, 4  ;;  %v3795_v8 = vrot.slane %v3793_v27, 5  ;;  %v3819_v17 = vrot.slane %v3817_v33, 5  ;;  %v7656_v48 = vld [vmem:[%s6496_s9 + $0xb0] sm:$0x1] }
  0xfc   : > { %v3805_v39 = vrot.slane %v3804_v22, 4  ;;  %v3815_v55 = vrot.slane %v3814_v23, 4  ;;  %v3829_v62 = vrot.slane %v3828_v59, 4  ;;  %v3852_v49 = vor.u32 %v3851_v18, %v3848_v63 }
  0xfd   : > { %5855 = vmatmul.mubr.msk.bf16.vlgmr.msra.gmra.mrb[0].mxu0 %vm656_vm3, %v7386_v16  ;;  %v7629_v16 = vsel %vm6748_vm7, %v7554_v28, %v8319_v31  ;;  %v3861_v28 = vrot.slane %v3859_v52, 4  ;;  %v3843_v26 = vrot.slane %v3841_v9, 5  ;;  %v3762_v52 = vsel %vm6522_vm4, %v3757_v40, %v7581_v61 }
  0xfe   : > { %5701 = vmatmul.mubr.msk.bf16.gmra.mrb[16].mxu1 %vm656_vm3, %v8318_v44  ;;  %5887 = vmatpush3.bf16.msra.mxu0 %v7327_v14  ;;  %v3767_v14 = vrot.slane %v3766_v4, 4  ;;  %v5344_v44 = vld [vmem:[%s6496_s9 + $0xa8] sm:$0xf]  ;;  %v3865_v22 = vshll.u32 %v7643_v57, 16  ;;  %v3786_v33 = vsel %vm6522_vm4, %v3781_v7, %v7593_v20  ;;  %v3796_v23 = vsel %vm6522_vm4, %v3791_v6, %v3795_v8 }
  0xff   : > { %5704 = vmatprep.mubr.msk.bf16.mxu1 %vm656_vm3, %v8320_v11  ;;  %5858 = vmatprep.mubr.msk.bf16.mxu0 %vm656_vm3, %v7397_v29  ;;  %v3839_v29 = vrot.slane %v3838_v60, 4  ;;  %v3870_v4 = vshrl.u32 %v5344_v44, 16  ;;  %v3873_v50 = vshll.u32 %v5344_v44, 16  ;;  %v3862_v53 = vor.u32 %v3861_v28, %v7639_v54  ;;  %v5393_v11 = vld [vmem:[%s6496_s9 + $0x48] sm:$0xe] }
 0x100   : > { %v3772_v27 = vsel %vm6522_vm4, %v3767_v14, %v3771_v51  ;;  %v3879_v59 = vshll.u32 %v7646_v34, 16  ;;  %v3883_v61 = vshrl.u32 %v7646_v34, 16  ;;  %v3810_v63 = vsel %vm6522_vm4, %v3805_v39, %v7595_v10  ;;  %v7721_v39 = vld [vmem:[%s6496_s9 + $0xb8] sm:$0xf] }
 0x101   : > { %v3820_v18 = vsel %vm6522_vm4, %v3815_v55, %v3819_v17  ;;  %v3834_v20 = vsel %vm6522_vm4, %v3829_v62, %v7605_v46  ;;  %v3853_v31 = vrot.slane %v3852_v49, 4  ;;  %v8321_v51 = vcombine.low %v7359_v12, %v7374_v35 }
 0x102   : > { %v3872_v10 = vrot.slane %v3870_v4, 4  ;;  %v3875_v60 = vrot.slane %v3873_v50, 5  ;;  %v3889_v9 = vshll.u32 %v7656_v48, 16  ;;  %v8322_v46 = vcombine.low %v7444_v21, %v7469_v56  ;;  %v5347_v21 = vld [vmem:[%s6496_s9 + $0xb4] sm:$0xf] }
 0x103   : > { %v5014_v12 = vcombine.low %v7520_v42, %v7527_v47  ;;  %v8323_v35 = vsel %vm6522_vm4, %v7540_v5, %v7529_v41  ;;  %v3863_v14 = vrot.slane %v3862_v53, 4  ;;  %v3867_v28 = vrot.slane %v3865_v22, 5  ;;  %v5395_v4 = vld [vmem:[%s6496_s9 + $0x60] sm:$0xe]  ;;  %v5396_v53 = vld [vmem:[%s6496_s9 + $0x6c] sm:$0xe] }
 0x104   : > { %v5015_v56 = vcombine.low %v7544_v43, %v7629_v16  ;;  %v7704_v44 = vcombine.low %v3762_v52, %v3772_v27  ;;  %v7706_v42 = vrot.slane %v3879_v59, 5  ;;  %v3885_v47 = vrot.slane %v3883_v61, 4  ;;  %v8332_v16 = vld [vmem:[#allocation7_spill] sm:$0xff] }
 0x105   : > { %5859 = vmatmul.mubr.msk.bf16.gmra.mrb[4].mxu0 %vm656_vm3, %v7500_v37  ;;  %v3844_v37 = vsel %vm6522_vm4, %v3839_v29, %v3843_v26  ;;  %v7708_v41 = vcombine.low %v3786_v33, %v3796_v23  ;;  %v7710_v5 = vcombine.low %v3810_v63, %v3820_v18  ;;  %v3858_v6 = vsel %vm6522_vm4, %v3853_v31, %v7639_v54  ;;  %v8325_v23 = vld [vmem:[#allocation14_spill] sm:$0xff]  ;;  %v5350_v63 = vld [vmem:[%s6496_s9 + $0xc0] sm:$0xf]  ;;  %v8327_v18 = vld [vmem:[#allocation12_spill] sm:$0xff] }
 0x106   : > { %5705 = vmatmul.mubr.msk.bf16.gmra.mrb[20].mxu1 %vm656_vm3, %v8321_v51  ;;  %5862 = vmatprep.mubr.msk.bf16.mxu0 %vm656_vm3, %v7514_v58  ;;  %v8324_v58 = vsel %vm6522_vm4, %v7502_v19, %v7457_v1  ;;  %v7712_v7 = vcombine.low %v3834_v20, %v3844_v37  ;;  %v5409_v1 = vrot.slane %v5393_v11, 9  ;;  %v5394_v19 = vld [vmem:[%s6496_s9 + $0x54] sm:$0xe]  ;;  %v3876_v8 = vor.u32 %v3875_v60, %v3872_v10 }
 0x107   : > { %5708 = vmatprep.mubr.msk.bf16.mxu1 %vm656_vm3, %v8322_v46  ;;  %v5363_v40 = vcombine.low %v8324_v58, %v8323_v35  ;;  %v7718_v17 = vrot.slane %v3889_v9, 5  ;;  %v3894_v55 = vshrl.u32 %v5347_v21, 16  ;;  %v3868_v62 = vsel %vm6522_vm4, %v3863_v14, %v3867_v28  ;;  %v8328_v31 = vld [vmem:[#allocation13_spill] sm:$0xff]  ;;  %v8329_v9 = vld [vmem:[#allocation15_spill] sm:$0xff]  ;;  %v7770_v35 = vld [vmem:[%s6496_s9 + $0xbc] sm:$0x1] }
 0x108   : > { %v3897_v49 = vshll.u32 %v5347_v21, 16  ;;  %v4353_v29 = vrot.slane %v7352_v0, 5  ;;  %v4356_v26 = vrot.slane %v7406_v38, 5  ;;  %v3886_v50 = vor.u32 %v3885_v47, %v7706_v42  ;;  %v7773_v58 = vld [vmem:[%s6496_s9 + $0xc4] sm:$0xf] }
 0x109   : > { %v5410_v52 = vrot.slane %v5394_v19, 9  ;;  %v4360_v54 = vrot.slane %v7363_v24, 5  ;;  %v4363_v27 = vrot.slane %v7415_v15, 5  ;;  %v3903_v22 = vshll.u32 %v7721_v39, 16  ;;  %v5397_v19 = vld [vmem:[%s6496_s9 + $0x78] sm:$0xe] }
 0x10a   : > { %v3907_v33 = vshrl.u32 %v7721_v39, 16  ;;  %v7738_v0 = vsel %vm6748_vm7, %v5409_v1, %v4353_v29  ;;  %v4355_v38 = vrot.slane %v4353_v29, 4  ;;  %v8326_v59 = vcombine.low %v7477_v36, %v8325_v23  ;;  %v8330_v23 = vld [vmem:[#allocation16_spill] sm:$0xff] }
 0x10b   : > { %v7745_v24 = vcombine.low %v3858_v6, %v3868_v62  ;;  %v7749_v15 = vsel %vm6748_vm7, %v5410_v52, %v4360_v54  ;;  %v5411_v61 = vrot.slane %v5395_v4, 9  ;;  %v4367_v20 = vrot.slane %v8327_v18, 5  ;;  %v6262_v6 = vld [vmem:[%s6496_s9 + $0xc] sm:$0xff]  }
 0x10c   : > { %v7755_v36 = vsel %vm6748_vm7, %v4355_v38, %v4356_v26  ;;  %v4370_v51 = vrot.slane %v8328_v31, 5  ;;  %v5412_v37 = vrot.slane %v5396_v53, 9  ;;  %v4374_v11 = vrot.slane %v8329_v9, 5 }
 0x10d   : > { %5863 = vmatmul.mubr.msk.bf16.gmra.mrb[8].mxu0 %vm656_vm3, %v7523_v30  ;;  %v4362_v30 = vrot.slane %v4360_v54, 4  ;;  %v5426_v10 = vcombine.low %v7738_v0, %v7755_v36  ;;  %v4377_v46 = vrot.slane %v7573_v45, 5  ;;  %v7779_v14 = vsel %vm6748_vm7, %v5411_v61, %v4367_v20 }
 0x10e   : > { %5709 = vmatmul.mubr.msk.bf16.gmra.mrb[24].mxu1 %vm656_vm3, %v8326_v59  ;;  %5866 = vmatprep.mubr.msk.bf16.mxu0 %vm656_vm3, %v5363_v40  ;;  %v4369_v28 = vrot.slane %v4367_v20, 4  ;;  %v7781_v21 = vrot.slane %v3894_v55, 4  ;;  %v3918_v47 = vshrl.u32 %v5350_v63, 16  ;;  %v7785_v45 = vsel %vm6748_vm7, %v5412_v37, %v4374_v11  ;;  %v5124_v55 = vld [vmem:[%s6496_s9 + $0x78] sm:$0xf]  ;;  %v8331_v59 = vld [vmem:[#allocation19_spill] sm:$0xff] }
 0x10f   : > { %5712 = vmatprep.mubr.msk.bf16.mxu1 %vm656_vm3, %v5014_v12  ;;  %v7763_v60 = vsel %vm6748_vm7, %v4362_v30, %v4363_v27  ;;  %v7767_v12 = vrot.slane %v3876_v8, 4  ;;  %v4376_v1 = vrot.slane %v4374_v11, 4  ;;  %v7789_v8 = vrot.slane %v3886_v50, 4 }
 0x110   : > { %v5427_v40 = vcombine.low %v7749_v15, %v7763_v60  ;;  %v7791_v62 = vrot.slane %v3897_v49, 5  ;;  %v3921_v29 = vshll.u32 %v5350_v63, 16  ;;  %v7795_v26 = vsel %vm6748_vm7, %v4369_v28, %v4370_v51  ;;  %v8334_v28 = vld [vmem:[#allocation17_spill] sm:$0xff]  ;;  %v6325_v60 = vld [vmem:[%s6496_s9 + $0xa0] sm:$0xf] }
 0x111   : > { %v7798_v4 = vrot.slane %v3903_v22, 5  ;;  %v7800_v52 = vrot.slane %v3907_v33, 4  ;;  %v5428_v54 = vcombine.low %v7779_v14, %v7795_v26  ;;  %v7806_v27 = vsel %vm6748_vm7, %v4376_v1, %v4377_v46  ;;  %v5398_v33 = vld [vmem:[%s6496_s9 + $0x84] sm:$0xe]  ;;  %v6263_v1 = vld [vmem:[%s6496_s9 + $0x18] sm:$0xff]  }
 0x112   : > { %v3913_v49 = vshll.u32 %v7770_v35, 16  ;;  %v3927_v50 = vshll.u32 %v7773_v58, 16  ;;  %v5429_v53 = vcombine.low %v7785_v45, %v7806_v27  ;;  %v5413_v22 = vrot.slane %v5397_v19, 9  ;;  %v6329_v27 = vld [vmem:[%s6496_s9 + $0xac] sm:$0xf] }
 0x113   : > { %v3920_v38 = vrot.slane %v3918_v47, 4  ;;  %v4384_v30 = vrot.slane %v8331_v59, 5  ;;  %v2243_v61 = vshrl.u32 %v5124_v55, 16  ;;  %v3923_v63 = vrot.slane %v3921_v29, 5  ;;  %v5353_v29 = vld [vmem:[%s6496_s9 + $0xcc] sm:$0xf] }
 0x114   : > { %v3931_v18 = vshrl.u32 %v7773_v58, 16  ;;  %v2246_v43 = vshll.u32 %v5124_v55, 16  ;;  %v5414_v37 = vrot.slane %v5398_v33, 9  ;;  %v3882_v9 = vsel %vm6522_vm4, %v7767_v12, %v7706_v42  ;;  %v7849_v55 = vld [vmem:[%s6496_s9 + $0xd0] sm:$0xf] }
 0x115   : > { %5867 = vmatmul.mubr.msk.bf16.gmra.mrb[12].mxu0 %vm656_vm3, %v7704_v44  ;;  %v4381_v44 = vrot.slane %v8330_v23, 5  ;;  %v2245_v51 = vrot.slane %v2243_v61, 4  ;;  %v3900_v11 = vor.u32 %v7791_v62, %v7781_v21  ;;  %v4388_v47 = vrot.slane %v8334_v28, 5  ;;  %v6264_v21 = vld [vmem:[%s6496_s9 + $0x24] sm:$0xff]  }
 0x116   : > { %5713 = vmatmul.mubr.msk.bf16.gmra.mrb[28].mxu1 %vm656_vm3, %v5015_v56  ;;  %5870 = vmatprep.mubr.msk.bf16.mxu0 %vm656_vm3, %v7708_v41  ;;  %v8333_v56 = vld [vmem:[#allocation8_spill] sm:$0xff]  ;;  %v2248_v46 = vrot.slane %v2246_v43, 5  ;;  %v3892_v19 = vsel %vm6522_vm4, %v7789_v8, %v7718_v17  ;;  %v4391_v12 = vrot.slane %v7601_v2, 5  ;;  %v7857_v62 = vrot.slane %v3927_v50, 5  ;;  %v5399_v8 = vld [vmem:[%s6496_s9 + $0x90] sm:$0xe] }
 0x117   : > { %5718 = vmatprep.mubr.msk.bf16.mxu1 %vm656_vm3, %v6262_v6  ;;  %v2265_v41 = vsel %vm6522_vm4, %v8333_v56, %v8332_v16  ;;  %v7831_v20 = vsel %vm6748_vm7, %v5413_v22, %v4381_v44  ;;  %v4383_v31 = vrot.slane %v4381_v44, 4  ;;  %v3910_v6 = vor.u32 %v7800_v52, %v7798_v4  ;;  %v7863_v52 = vld [vmem:[%s6496_s9 + $0xc8] sm:$0x1]  ;;  %v8336_v16 = vld [vmem:[#allocation5_spill] sm:$0xff] }
 0x118   : > { %v3933_v22 = vrot.slane %v3931_v18, 4  ;;  %v2249_v17 = vor.u32 %v2248_v46, %v2245_v51  ;;  %v3915_v23 = vrot.slane %v3913_v49, 5  ;;  %v3924_v44 = vor.u32 %v3923_v63, %v3920_v38  ;;  %v8337_v51 = vld [vmem:[#allocation6_spill] sm:$0xff] }
 0x119   : > { %v7853_v42 = vsel %vm6748_vm7, %v4383_v31, %v4384_v30  ;;  %v7867_v59 = vsel %vm6748_vm7, %v5414_v37, %v4388_v47  ;;  %v4390_v30 = vrot.slane %v4388_v47, 4  ;;  %v3942_v2 = vshrl.u32 %v5353_v29, 16 }
 0x11a   : > { %v5430_v33 = vcombine.low %v7831_v20, %v7853_v42  ;;  %v3945_v50 = vshll.u32 %v5353_v29, 16  ;;  %v3951_v61 = vshll.u32 %v7849_v55, 16  ;;  %v2250_v18 = vrot.slane %v2249_v17, 4  ;;  %v6265_v29 = vld [vmem:[%s6496_s9 + $0x30] sm:$0xff]  }
 0x11b   : > { %v3955_v49 = vshrl.u32 %v7849_v55, 16  ;;  %v7878_v38 = vsel %vm6748_vm7, %v4390_v30, %v4391_v12  ;;  %v5415_v63 = vrot.slane %v5399_v8, 9  ;;  %v3934_v56 = vor.u32 %v3933_v22, %v7857_v62 }
 0x11c   : > { %v3937_v31 = vshll.u32 %v7863_v52, 16  ;;  %v5431_v37 = vcombine.low %v7867_v59, %v7878_v38  ;;  %v5369_v46 = vcombine.low %v3882_v9, %v3892_v19  ;;  %v3901_v28 = vrot.slane %v3900_v11, 4  ;;  %v5400_v11 = vld [vmem:[%s6496_s9 + $0x9c] sm:$0xe] }
 0x11d   : > { %5871 = vmatmul.mubr.msk.bf16.gmra.mrb[16].mxu0 %vm656_vm3, %v7710_v5  ;;  %v8335_v5 = vld [vmem:[#allocation18_spill] sm:$0xff]  ;;  %v3911_v47 = vrot.slane %v3910_v6, 4  ;;  %v3925_v12 = vrot.slane %v3924_v44, 4  ;;  %v4398_v8 = vrot.slane %v7610_v3, 5  ;;  %v3944_v30 = vrot.slane %v3942_v2, 4 }
 0x11e   : > { %5719 = vmatmul.mubr.msk.bf16.vlgmr.msra.gmra.mrb[0].mxu1 %vm656_vm3, %v6263_v1  ;;  %5874 = vmatprep.mubr.msk.bf16.mxu0 %vm656_vm3, %v7712_v7  ;;  %v4395_v43 = vrot.slane %v8335_v5, 5  ;;  %v2255_v7 = vsel %vm6522_vm4, %v2250_v18, %v8337_v51  ;;  %v3947_v18 = vrot.slane %v3945_v50, 5  ;;  %v7901_v5 = vrot.slane %v3951_v61, 5  ;;  %v6266_v19 = vld [vmem:[%s6496_s9 + $0x3c] sm:$0xff]  }
 0x11f   : > { %5921 = vmatpush3.bf16.msra.mxu1 %v8336_v16  ;;  %5722 = vmatprep.mubr.msk.bf16.mxu1 %vm656_vm3, %v6264_v21  ;;  %v7890_v1 = vcombine.low %v2255_v7, %v2265_v41  ;;  %v7894_v21 = vld [vmem:[%s6496_s9 + $0xd4] sm:$0x1]  ;;  %v3957_v9 = vrot.slane %v3955_v49, 4  ;;  %v3935_v41 = vrot.slane %v3934_v56, 4  ;;  %v3939_v6 = vrot.slane %v3937_v31, 5 }
 0x120   : > { %v7898_v22 = vsel %vm6748_vm7, %v5415_v63, %v4395_v43  ;;  %v4397_v17 = vrot.slane %v4395_v43, 4  ;;  %v3906_v63 = vsel %vm6522_vm4, %v3901_v28, %v7798_v4  ;;  %v3916_v2 = vsel %vm6522_vm4, %v3911_v47, %v3915_v23  ;;  %v6316_v16 = vld [vmem:[%s6496_s9 + $0x1c] sm:$0xf]  ;;  %v5401_v28 = vld [vmem:[%s6496_s9 + $0xa8] sm:$0xe] }
 0x121   : > { %v3961_v50 = vshll.u32 %v7894_v21, 16  ;;  %v5416_v61 = vrot.slane %v5400_v11, 9  ;;  %v4402_v49 = vrot.slane %v7598_v25, 5  ;;  %v3930_v4 = vsel %vm6522_vm4, %v3925_v12, %v7857_v62  ;;  %v5389_v62 = vld [vmem:[%s6496_s9 + $0x18] sm:$0xe]  ;;  %v6267_v47 = vld [vmem:[%s6496_s9 + $0x48] sm:$0xff]  }
 0x122   : > { %v7907_v44 = vsel %vm6748_vm7, %v4397_v17, %v4398_v8  ;;  %v3958_v43 = vor.u32 %v3957_v9, %v7901_v5  ;;  %v4405_v23 = vrot.slane %v7643_v57, 5  ;;  %v3940_v25 = vsel %vm6522_vm4, %v3935_v41, %v3939_v6  ;;  %v6317_v11 = vld [vmem:[%s6496_s9 + $0x20] sm:$0x1] }
 0x123   : > { %v5432_v3 = vcombine.low %v7898_v22, %v7907_v44  ;;  %v4325_v56 = vrot.slane %v6316_v16, 5  ;;  %v7933_v31 = vsel %vm6748_vm7, %v5416_v61, %v4402_v49  ;;  %v4404_v51 = vrot.slane %v4402_v49, 4  ;;  %v5402_v49 = vld [vmem:[%s6496_s9 + $0xb4] sm:$0xe] }
 0x124   : > { %v5370_v7 = vcombine.low %v3906_v63, %v3916_v2  ;;  %v3959_v17 = vrot.slane %v3958_v43, 4  ;;  %v5417_v41 = vrot.slane %v5401_v28, 9  ;;  %v4409_v6 = vrot.slane %v7646_v34, 5  ;;  %v5390_v2 = vld [vmem:[%s6496_s9 + $0x24] sm:$0xe] }
 0x125   : > { %5875 = vmatmul.mubr.msk.bf16.gmra.mrb[20].mxu0 %vm656_vm3, %v7745_v24  ;;  %v3948_v24 = vor.u32 %v3947_v18, %v3944_v30  ;;  %v7938_v57 = vsel %vm6748_vm7, %v4404_v51, %v4405_v23  ;;  %v6268_v30 = vld [vmem:[%s6496_s9 + $0x54] sm:$0xff]   ;;  %v5405_v18 = vrot.slane %v5389_v62, 9  ;;  %v4327_v9 = vrot.slane %v4325_v56, 4  ;;  %v6320_v28 = vld [vmem:[%s6496_s9 + $0x2c] sm:$0x1] }
 0x126   : > { %5723 = vmatmul.mubr.msk.bf16.gmra.mrb[4].mxu1 %vm656_vm3, %v6265_v29  ;;  %5878 = vmatprep.mubr.msk.bf16.mxu0 %vm656_vm3, %v5369_v46  ;;  %v3963_v46 = vrot.slane %v3961_v50, 5  ;;  %v5371_v29 = vcombine.low %v3930_v4, %v3940_v25  ;;  %v5433_v8 = vcombine.low %v7933_v31, %v7938_v57  ;;  %v4412_v63 = vrot.slane %v7656_v48, 5  ;;  %v6318_v50 = vld [vmem:[%s6496_s9 + $0x28] sm:$0xf]  ;;  %v5391_v25 = vld [vmem:[%s6496_s9 + $0x30] sm:$0xe] }
 0x127   : > { %5726 = vmatprep.mubr.msk.bf16.mxu1 %vm656_vm3, %v6266_v19  ;;  %v3949_v12 = vrot.slane %v3948_v24, 4  ;;  %v4328_v19 = vrot.slane %v6317_v11, 5  ;;  %v4332_v61 = vrot.slane %v6318_v50, 5  ;;  %v7961_v48 = vsel %vm6748_vm7, %v5417_v41, %v4409_v6  ;;  %v6270_v11 = vld [vmem:[%s6496_s9 + $0x6c] sm:$0xff]   ;;  %v5403_v50 = vld [vmem:[%s6496_s9 + $0xc0] sm:$0xe] }
 0x128   : > { %v3964_v34 = vsel %vm6522_vm4, %v3959_v17, %v3963_v46  ;;  %v4411_v24 = vrot.slane %v4409_v6, 4  ;;  %v4326_v43 = vsel %vm6748_vm7, %v5405_v18, %v4325_v56  ;;  %v5406_v51 = vrot.slane %v5390_v2, 9  ;;  %v8338_v41 = vld [vmem:[#allocation9_spill] sm:$0xff]  ;;  %v6334_v31 = vld [vmem:[%s6496_s9 + $0xc8] sm:$0x1] }
 0x129   : > { %v3954_v4 = vsel %vm6522_vm4, %v3949_v12, %v7901_v5  ;;  %v4329_v23 = vsel %vm6748_vm7, %v4327_v9, %v4328_v19  ;;  %v6319_v5 = vld [vmem:[%s6496_s9 + $0x34] sm:$0xf]  ;;  %v6269_v12 = vld [vmem:[%s6496_s9 + $0x60] sm:$0xff]   ;;  %v5407_v18 = vrot.slane %v5391_v25, 9  ;;  %v4419_v9 = vrot.slane %v7770_v35, 5 }
 0x12a   : > { %v4339_v16 = vrot.slane %v6319_v5, 5  ;;  %v7972_v62 = vsel %vm6748_vm7, %v4411_v24, %v4412_v63  ;;  %v5372_v46 = vcombine.low %v3954_v4, %v3964_v34  ;;  %v5422_v17 = vcombine.low %v4326_v43, %v4329_v23  ;;  %v5392_v24 = vld [vmem:[%s6496_s9 + $0x3c] sm:$0xe] }
 0x12b   : > { %v5434_v56 = vcombine.low %v7961_v48, %v7972_v62  ;;  %v4342_v6 = vrot.slane %v8338_v41, 5  ;;  %v4333_v35 = vsel %vm6748_vm7, %v5406_v51, %v4332_v61  ;;  %v5419_v5 = vrot.slane %v5403_v50, 9 }
 0x12c   : > { %v4341_v19 = vrot.slane %v4339_v16, 4  ;;  %v4340_v23 = vsel %vm6748_vm7, %v5407_v18, %v4339_v16  ;;  %v4426_v51 = vrot.slane %v7863_v52, 5  ;;  %v2406_v57 = vshll.u32 %v6334_v31, 16 }
 0x12d   : > { %5879 = vmatmul.mubr.msk.bf16.gmra.mrb[24].mxu0 %vm656_vm3, %v5370_v7  ;;  %v5418_v7 = vrot.slane %v5402_v49, 9 }
 0x12e   : > { %5727 = vmatmul.mubr.msk.bf16.gmra.mrb[8].mxu1 %vm656_vm3, %v6267_v47  ;;  %5882 = vmatprep.mubr.msk.bf16.mxu0 %vm656_vm3, %v5371_v29  ;;  %v4335_v47 = vrot.slane %v6320_v28, 5  ;;  %v4416_v29 = vrot.slane %v7721_v39, 5  ;;  %v8339_v39 = vld [vmem:[#allocation10_spill] sm:$0xff]  ;;  %v4343_v25 = vsel %vm6748_vm7, %v4341_v19, %v4342_v6  ;;  %v5408_v28 = vrot.slane %v5392_v24, 9 }
 0x12f   : > { %5730 = vmatprep.mubr.msk.bf16.mxu1 %vm656_vm3, %v6268_v30  ;;  %v4334_v30 = vrot.slane %v4332_v61, 4  ;;  %v4346_v49 = vrot.slane %v8339_v39, 5  ;;  %v4423_v61 = vrot.slane %v7773_v58, 5  ;;  %v6321_v39 = vld [vmem:[%s6496_s9 + $0x70] sm:$0xf]  ;;  %v4430_v24 = vrot.slane %v7849_v55, 5 }
 0x130   : > { %v7984_v63 = vsel %vm6748_vm7, %v5418_v7, %v4416_v29  ;;  %v4418_v2 = vrot.slane %v4416_v29, 4  ;;  %v5121_v7 = vld [vmem:[%s6496_s9 + $0x6c] sm:$0xf]  ;;  %v8340_v29 = vld [vmem:[#allocation11_spill] sm:$0xff] }
 0x131   : > { %v4336_v34 = vsel %vm6748_vm7, %v4334_v30, %v4335_v47  ;;  %v4348_v47 = vrot.slane %v4346_v49, 4  ;;  %v6271_v30 = vld [vmem:[%s6496_s9 + $0x78] sm:$0xff]   ;;  %v8015_v16 = vsel %vm6748_vm7, %v5419_v5, %v4423_v61  ;;  %v4425_v18 = vrot.slane %v4423_v61, 4 }
 0x132   : > { %v7991_v4 = vsel %vm6748_vm7, %v4418_v2, %v4419_v9  ;;  %v5424_v9 = vcombine.low %v4340_v23, %v4343_v25  ;;  %v2219_v19 = vshrl.u32 %v5121_v7, 16  ;;  %v2222_v41 = vshll.u32 %v5121_v7, 16 }
 0x133   : > { %v5435_v43 = vcombine.low %v7984_v63, %v7991_v4  ;;  %v8020_v58 = vsel %vm6748_vm7, %v4425_v18, %v4426_v51  ;;  %v4347_v6 = vsel %vm6748_vm7, %v5408_v28, %v4346_v49  ;;  %v4433_v49 = vrot.slane %v7894_v21, 5  ;;  %v6273_v51 = vld [vmem:[%s6496_s9 + $0x90] sm:$0xff]   ;;  %v6274_v21 = vld [vmem:[%s6496_s9 + $0x9c] sm:$0xff]  }
 0x134   : > { %v5436_v50 = vcombine.low %v8015_v16, %v8020_v58  ;;  %v2221_v23 = vrot.slane %v2219_v19, 4  ;;  %v2224_v25 = vrot.slane %v2222_v41, 5  ;;  %v4432_v7 = vrot.slane %v4430_v24, 4 }
 0x135   : > { %5883 = vmatmul.mubr.msk.bf16.gmra.mrb[28].mxu0 %vm656_vm3, %v5372_v46  ;;  %v5423_v46 = vcombine.low %v4333_v35, %v4336_v34  ;;  %v2228_v35 = vshll.u32 %v6321_v39, 16  ;;  %v2232_v34 = vshrl.u32 %v6321_v39, 16 }
 0x136   : > { %5731 = vmatmul.mubr.msk.bf16.gmra.mrb[12].mxu1 %vm656_vm3, %v6269_v12  ;;  %5888 = vmatprep.mubr.msk.bf16.mxu0 %vm656_vm3, %v5422_v17  ;;  %v4349_v12 = vrot.slane %v8340_v29, 5  ;;  %v5404_v17 = vld [vmem:[%s6496_s9 + $0xcc] sm:$0xe]  ;;  %v8042_v55 = vsel %vm6748_vm7, %v4432_v7, %v4433_v49 }
 0x137   : > { %5734 = vmatprep.mubr.msk.bf16.mxu1 %vm656_vm3, %v6270_v11  ;;  %v6272_v11 = vld [vmem:[%s6496_s9 + $0x84] sm:$0xff]   ;;  %v5420_v52 = vrot.slane %v5404_v17, 9  ;;  %v2234_v28 = vrot.slane %v2232_v34, 4  ;;  %v6322_v17 = vld [vmem:[%s6496_s9 + $0x74] sm:$0x1] }
 0x138   : > { %v4350_v2 = vsel %vm6748_vm7, %v4348_v47, %v4349_v12  ;;  %v5127_v47 = vld [vmem:[%s6496_s9 + $0x84] sm:$0xf]  ;;  %v2225_v12 = vor.u32 %v2224_v25, %v2221_v23  ;;  %v6276_v34 = vld [vmem:[%s6496_s9 + $0xb4] sm:$0xff]  }
 0x139   : > { %v8037_v5 = vsel %vm6748_vm7, %v5420_v52, %v4430_v24  ;;  %v5425_v61 = vcombine.low %v4347_v6, %v4350_v2  ;;  %v2270_v18 = vshll.u32 %v5127_v47, 16  ;;  %v5130_v6 = vld [vmem:[%s6496_s9 + $0x90] sm:$0xf]  ;;  %v6275_v2 = vld [vmem:[%s6496_s9 + $0xa8] sm:$0xff]  }
 0x13a   : > { %v5437_v29 = vcombine.low %v8037_v5, %v8042_v55  ;;  %v2226_v52 = vrot.slane %v2225_v12, 4  ;;  %v2291_v23 = vshrl.u32 %v5130_v6, 16  ;;  %v2294_v25 = vshll.u32 %v5130_v6, 16 }
 0x13b   : > { %v2324_v12 = vshll.u32 %v6325_v60, 16 }
 0x13c   : > { %v2296_v14 = vrot.slane %v2294_v25, 5  ;;  %v6328_v25 = vld [vmem:[%s6496_s9 + $0xa4] sm:$0x1] }
 0x13d   : > { %5889 = vmatmul.mubr.msk.bf16.vlgmr.msra.gmra.mrb[0].mxu0 %vm656_vm3, %v5423_v46  ;;  %v2230_v46 = vrot.slane %v2228_v35, 5  ;;  %v5133_v35 = vld [vmem:[%s6496_s9 + $0x9c] sm:$0xf]  ;;  %v8084_v6 = vrot.slane %v2324_v12, 5 }
 0x13e   : > { %5735 = vmatmul.mubr.msk.bf16.gmra.mrb[16].mxu1 %vm656_vm3, %v6271_v30  ;;  %5892 = vmatprep.mubr.msk.bf16.mxu0 %vm656_vm3, %v5424_v9  ;;  %v2238_v30 = vshll.u32 %v6322_v17, 16  ;;  %v2267_v9 = vshrl.u32 %v5127_v47, 16  ;;  %v2318_v47 = vshll.u32 %v5133_v35, 16  ;;  %v6326_v17 = vld [vmem:[%s6496_s9 + $0x8c] sm:$0x1] }
 0x13f   : > { %5738 = vmatprep.mubr.msk.bf16.mxu1 %vm656_vm3, %v6272_v11  ;;  %v2235_v13 = vor.u32 %v2234_v28, %v2230_v46  ;;  %v6323_v11 = vld [vmem:[%s6496_s9 + $0x88] sm:$0xf]  ;;  %v2231_v7 = vsel %vm6522_vm4, %v2226_v52, %v2230_v46 }
 0x140   : > { %v2276_v19 = vshll.u32 %v6323_v11, 16  ;;  %v2280_v41 = vshrl.u32 %v6323_v11, 16  ;;  %v2240_v0 = vrot.slane %v2238_v30, 5  ;;  %v2269_v36 = vrot.slane %v2267_v9, 4 }
 0x141   : > { %v2236_v39 = vrot.slane %v2235_v13, 4  ;;  %v2286_v30 = vshll.u32 %v6326_v17, 16  ;;  %v2293_v9 = vrot.slane %v2291_v23, 4  ;;  %v2320_v11 = vrot.slane %v2318_v47, 5 }
 0x142   : > { %v8061_v24 = vrot.slane %v2276_v19, 5  ;;  %v2282_v49 = vrot.slane %v2280_v41, 4  ;;  %v6277_v19 = vld [vmem:[%s6496_s9 + $0xc0] sm:$0xff]  }
 0x143   : > { %v2241_v46 = vsel %vm6522_vm4, %v2236_v39, %v2240_v0  ;;  %v5136_v39 = vld [vmem:[%s6496_s9 + $0xa8] sm:$0xf] }
 0x144   : > { %v2283_v13 = vor.u32 %v2282_v49, %v8061_v24  ;;  %v5154_v41 = vcombine.low %v2231_v7, %v2241_v46  ;;  %v2334_v7 = vshll.u32 %v6328_v25, 16  ;;  %v2342_v45 = vshll.u32 %v5136_v39, 16 }
 0x145   : > { %5893 = vmatmul.mubr.msk.bf16.gmra.mrb[4].mxu0 %vm656_vm3, %v5425_v61  ;;  %v6324_v61 = vld [vmem:[%s6496_s9 + $0x94] sm:$0xf] }
 0x146   : > { %5739 = vmatmul.mubr.msk.bf16.gmra.mrb[20].mxu1 %vm656_vm3, %v6273_v51  ;;  %5896 = vmatprep.mubr.msk.bf16.mxu0 %vm656_vm3, %v5426_v10  ;;  %v2272_v10 = vrot.slane %v2270_v18, 5  ;;  %v2300_v51 = vshll.u32 %v6324_v61, 16  ;;  %v2304_v28 = vshrl.u32 %v6324_v61, 16  ;;  %v2284_v0 = vrot.slane %v2283_v13, 4 }
 0x147   : > { %5742 = vmatprep.mubr.msk.bf16.mxu1 %vm656_vm3, %v6274_v21  ;;  %v2315_v21 = vshrl.u32 %v5133_v35, 16  ;;  %v6327_v35 = vld [vmem:[%s6496_s9 + $0x98] sm:$0x1]  ;;  %v2339_v61 = vshrl.u32 %v5136_v39, 16  ;;  %v5142_v39 = vld [vmem:[%s6496_s9 + $0xc0] sm:$0xf] }
 0x148   : > { %v2273_v15 = vor.u32 %v2272_v10, %v2269_v36  ;;  %v8081_v26 = vrot.slane %v2300_v51, 5  ;;  %v2288_v36 = vrot.slane %v2286_v30, 5  ;;  %v2297_v10 = vor.u32 %v2296_v14, %v2293_v9  ;;  %v5139_v51 = vld [vmem:[%s6496_s9 + $0xb4] sm:$0xf] }
 0x149   : > { %v2317_v18 = vrot.slane %v2315_v21, 4  ;;  %v2352_v21 = vshrl.u32 %v6329_v27, 16  ;;  %v2363_v20 = vshrl.u32 %v5139_v51, 16  ;;  %v2366_v42 = vshll.u32 %v5139_v51, 16 }
 0x14a   : > { %v2274_v52 = vrot.slane %v2273_v15, 4  ;;  %v2289_v46 = vsel %vm6522_vm4, %v2284_v0, %v2288_v36  ;;  %v2298_v15 = vrot.slane %v2297_v10, 4  ;;  %v2336_v30 = vrot.slane %v2334_v7, 5 }
 0x14b   : > { %v2321_v23 = vor.u32 %v2320_v11, %v2317_v18  ;;  %v2341_v9 = vrot.slane %v2339_v61, 4  ;;  %v2354_v11 = vrot.slane %v2352_v21, 4  ;;  %v6333_v61 = vld [vmem:[%s6496_s9 + $0xbc] sm:$0x1] }
 0x14c   : > { %v2279_v47 = vsel %vm6522_vm4, %v2274_v52, %v8061_v24  ;;  %v2303_v0 = vsel %vm6522_vm4, %v2298_v15, %v8081_v26  ;;  %v2382_v22 = vshll.u32 %v6333_v61, 16 }
 0x14d   : > { %5897 = vmatmul.mubr.msk.bf16.gmra.mrb[8].mxu0 %vm656_vm3, %v5427_v40  ;;  %v2328_v40 = vshrl.u32 %v6325_v60, 16  ;;  %v2322_v17 = vrot.slane %v2321_v23, 4  ;;  %v5156_v24 = vcombine.low %v2279_v47, %v2289_v46 }
 0x14e   : > { %5743 = vmatmul.mubr.msk.bf16.gmra.mrb[24].mxu1 %vm656_vm3, %v6275_v2  ;;  %5900 = vmatprep.mubr.msk.bf16.mxu0 %vm656_vm3, %v5428_v54  ;;  %v2306_v54 = vrot.slane %v2304_v28, 4 }
 0x14f   : > { %5746 = vmatprep.mubr.msk.bf16.mxu1 %vm656_vm3, %v6276_v34  ;;  %v2330_v2 = vrot.slane %v2328_v40, 4  ;;  %v2310_v34 = vshll.u32 %v6327_v35, 16  ;;  %v2327_v10 = vsel %vm6522_vm4, %v2322_v17, %v8084_v6  ;;  %v2408_v17 = vrot.slane %v2406_v57, 5 }
 0x150   : > { %v2307_v49 = vor.u32 %v2306_v54, %v8081_v26  ;;  %v2344_v54 = vrot.slane %v2342_v45, 5  ;;  %v6331_v26 = vld [vmem:[%s6496_s9 + $0xb0] sm:$0x1] }
 0x151   : > { %v2331_v28 = vor.u32 %v2330_v2, %v8084_v6  ;;  %v2312_v60 = vrot.slane %v2310_v34, 5  ;;  %v2358_v35 = vshll.u32 %v6331_v26, 16  ;;  %v2387_v34 = vshrl.u32 %v5142_v39, 16 }
 0x152   : > { %v2308_v13 = vrot.slane %v2307_v49, 4  ;;  %v2345_v38 = vor.u32 %v2344_v54, %v2341_v9  ;;  %v2390_v6 = vshll.u32 %v5142_v39, 16  ;;  %v6332_v49 = vld [vmem:[%s6496_s9 + $0xc4] sm:$0xf] }
 0x153   : > { %v2332_v14 = vrot.slane %v2331_v28, 4  ;;  %v2396_v23 = vshll.u32 %v6332_v49, 16  ;;  %v2400_v25 = vshrl.u32 %v6332_v49, 16  ;;  %v2360_v45 = vrot.slane %v2358_v35, 5 }
 0x154   : > { %v2313_v36 = vsel %vm6522_vm4, %v2308_v13, %v2312_v60  ;;  %v2346_v51 = vrot.slane %v2345_v38, 4  ;;  %v2384_v60 = vrot.slane %v2382_v22, 5 }
 0x155   : > { %5901 = vmatmul.mubr.msk.bf16.gmra.mrb[12].mxu0 %vm656_vm3, %v5429_v53  ;;  %v2348_v53 = vshll.u32 %v6329_v27, 16  ;;  %v2337_v59 = vsel %vm6522_vm4, %v2332_v14, %v2336_v30  ;;  %v5157_v44 = vcombine.low %v2303_v0, %v2313_v36  ;;  %v2389_v27 = vrot.slane %v2387_v34, 4  ;;  %v8175_v0 = vld [vmem:[%s8270_s2] ss:$0 sm:$0xff] }
 0x156   : > { %5747 = vmatmul.mubr.msk.bf16.gmra.mrb[28].mxu1 %vm656_vm3, %v6277_v19  ;;  %5904 = vmatprep.mubr.msk.bf16.mxu0 %vm656_vm3, %v5430_v33  ;;  %v6330_v33 = vld [vmem:[%s6496_s9 + $0xb8] sm:$0xf]  ;;  %v2365_v19 = vrot.slane %v2363_v20, 4  ;;  %v2398_v21 = vrot.slane %v2396_v23, 5  ;;  %v2402_v47 = vrot.slane %v2400_v25, 4  ;;  %s4916_s9 = sshll.u32 %s161_s8, 5 }
 0x157   : > { %5768 = vmatprep.mubr.msk.bf16.mxu1 %vm656_vm3, %v5154_v41  ;;  %v2372_v12 = vshll.u32 %v6330_v33, 16  ;;  %v2376_v40 = vshrl.u32 %v6330_v33, 16  ;;  %v2350_v18 = vrot.slane %v2348_v53, 5  ;;  %v2368_v41 = vrot.slane %v2366_v42, 5  ;;  %s163_s10 = scalar_lea.vmem [#allocation2], %s4916_s9 }
 0x158   : > { %v2392_v53 = vrot.slane %v2390_v6, 5  ;;  %s4850_s11 = sshll.u32 %s163_s10, 4  ;;  %s8220_s11 = int_to_ptr.vmem [resolvable:$true] %s4850_s11 }
 0x159   : > { %v2374_v52 = vrot.slane %v2372_v12, 5  ;;  %v2378_v2 = vrot.slane %v2376_v40, 4  ;;  %v2351_v20 = vsel %vm6522_vm4, %v2346_v51, %v2350_v18  ;;  %v2403_v12 = vor.u32 %v2402_v47, %v2398_v21  ;;  %s6335_s26 = scalar_lea.vmem %s8220_s11, 512  ;;  %p6342_p0 = scmp.lt.s32.totalorder %s8220_s11, %s6340_s27 }
 0x15a   : > { %v2393_v33 = vor.u32 %v2392_v53, %v2389_v27  ;;  %p6336_p11 = scmp.ne.s32.totalorder %s8220_s11, %s6335_s26  ;;  %p6343_p1 = scmp.lt.s32.totalorder %s6341_s28, %s6335_s26 }
 0x15b   : > { %v2379_v7 = vor.u32 %v2378_v2, %v2374_v52  ;;  %v2404_v13 = vrot.slane %v2403_v12, 4 }
 0x15c   : > { %v2394_v40 = vrot.slane %v2393_v33, 4  ;;  %p6337_p12 = pnand %p6336_p11, %p6460_p5  ;;  %p6344_p2 = por %p6343_p1, %p6342_p0 }
 0x15d   : > { %5905 = vmatmul.mubr.msk.bf16.gmra.mrb[16].mxu0 %vm656_vm3, %v5431_v37  ;;  %v2355_v37 = vor.u32 %v2354_v11, %v2350_v18  ;;  %v2380_v15 = vrot.slane %v2379_v7, 4  ;;  %v2409_v9 = vsel %vm6522_vm4, %v2404_v13, %v2408_v17 }
 0x15e   : > { %5769 = vmatmul.mubr.msk.bf16.vlgmr.msra.gmra.mrb[16].mxu1 %vm656_vm3, %v7890_v1  ;;  %5908 = vmatprep.mubr.msk.bf16.mxu0 %vm656_vm3, %v5432_v3  ;;  %v2369_v1 = vor.u32 %v2368_v41, %v2365_v19  ;;  %v5158_v3 = vcombine.low %v2327_v10, %v2337_v59  ;;  %v2399_v30 = vsel %vm6522_vm4, %v2394_v40, %v2398_v21  ;;  %p6338_p13 = pneg %p6337_p12 }
 0x15f   : > { %5772 = vmatprep.mubr.msk.bf16.mxu1 %vm656_vm3, %v5156_v24  ;;  %v2356_v28 = vrot.slane %v2355_v37, 4  ;;  %v2385_v48 = vsel %vm6522_vm4, %v2380_v15, %v2384_v60  ;;  %v5161_v14 = vcombine.low %v2399_v30, %v2409_v9 }
 0x160   : > { %v2370_v46 = vrot.slane %v2369_v1, 4  ;;  %p6345_p3 = pnand %p6344_p2, %p6338_p13 }
 0x161   : > { %v2361_v42 = vsel %vm6522_vm4, %v2356_v28, %v2360_v45 }
 0x162   : > { %v5159_v62 = vcombine.low %v2351_v20, %v2361_v42 }
 0x165   : > { %5909 = vmatmul.mubr.msk.bf16.gmra.mrb[20].mxu0 %vm656_vm3, %v5433_v8  ;;  %v2375_v8 = vsel %vm6522_vm4, %v2370_v46, %v2374_v52 }
 0x166   : > { %5773 = vmatmul.mubr.msk.bf16.gmra.mrb[20].mxu1 %vm656_vm3, %v5157_v44  ;;  %5912 = vmatprep.mubr.msk.bf16.mxu0 %vm656_vm3, %v5434_v56  ;;  %v5160_v56 = vcombine.low %v2375_v8, %v2385_v48 }
 0x167   : > { %5776 = vmatprep.mubr.msk.bf16.mxu1 %vm656_vm3, %v5158_v3 }
 0x16d   : > { %5913 = vmatmul.mubr.msk.bf16.gmra.mrb[24].mxu0 %vm656_vm3, %v5435_v43 }
 0x16e   : > { %5777 = vmatmul.mubr.msk.bf16.gmra.mrb[24].mxu1 %vm656_vm3, %v5159_v62  ;;  %5916 = vmatprep.mubr.msk.bf16.mxu0 %vm656_vm3, %v5436_v50 }
 0x16f   : > { %5780 = vmatprep.mubr.msk.bf16.mxu1 %vm656_vm3, %v5160_v56 }
 0x175   : > { %5917 = vmatmul.mubr.msk.bf16.gmra.mrb[28].mxu0 %vm656_vm3, %v5437_v29 }
 0x176   : > { %5781 = vmatmul.mubr.msk.bf16.gmra.mrb[28].mxu1 %vm656_vm3, %v5161_v14 }
 0x1f1   : > { %v5720_v63 = vpop.f32.mrb[0].mxu1 }
 0x1f2   : > { %v1819_v4 = vpop.f32.mrb[1].mxu1 }
 0x1f3   : > { %v5721_v43 = vpop.f32.mrb[2].mxu1 }
 0x1f4   : > { %v1822_v16 = vpop.f32.mrb[3].mxu1 }
 0x1f9   : > { %v5724_v58 = vpop.f32.mrb[4].mxu1 }
 0x1fa   : > { %v1835_v50 = vpop.f32.mrb[5].mxu1 }
 0x1fb   : > { %v5725_v54 = vpop.f32.mrb[6].mxu1 }
 0x1fc   : > { %v1838_v18 = vpop.f32.mrb[7].mxu1 }
 0x201   : > { %v5728_v11 = vpop.f32.mrb[8].mxu1 }
 0x202   : > { %v1851_v24 = vpop.f32.mrb[9].mxu1 }
 0x203   : > { %v5729_v32 = vpop.f32.mrb[10].mxu1 }
 0x204   : > { %v1854_v19 = vpop.f32.mrb[11].mxu1 }
 0x209   : > { %v5732_v41 = vpop.f32.mrb[12].mxu1 }
 0x20a   : > { %v1867_v52 = vpop.f32.mrb[13].mxu1 }
 0x20b   : > { %v5733_v2 = vpop.f32.mrb[14].mxu1 }
 0x20c   : > { %v1870_v5 = vpop.f32.mrb[15].mxu1 }
 0x210   : > { %v5890_v55 = vpop.f32.mrb[0].mxu0 }
 0x211   : > { %v5922_v29 = vadd.f32 %v5890_v55, %v5720_v63  ;;  %v4570_v39 = vpop.f32.mrb[1].mxu0 }
 0x212   : > { %v5923_v36 = vadd.f32 %v4570_v39, %v1819_v4  ;;  %v5891_v10 = vpop.f32.mrb[2].mxu0 }
 0x213   : > { %v5924_v59 = vadd.f32 %v5891_v10, %v5721_v43  ;;  %v4573_v38 = vpop.f32.mrb[3].mxu0  ;;  %v4738_v22 = vadd.f32 %v5922_v29, %v8175_v0 }
 0x214   : > { %v5925_v37 = vadd.f32 %v4573_v38, %v1822_v16  ;;  %v4736_v26 = vadd.f32 %v5923_v36, %v8175_v0 }
 0x215   : > { %v4739_v3 = vadd.f32 %v5924_v59, %v8175_v0 }
 0x216   : > { %4768 = vxpose.xlu0.b32.start [1/16] (narrow) %v4736_v26, 16  ;;  %v4737_v34 = vadd.f32 %v5925_v37, %v8175_v0 }
 0x218   : > { %v5894_v35 = vpop.f32.mrb[4].mxu0 }
 0x219   : > { %v5926_v6 = vadd.f32 %v5894_v35, %v5724_v58  ;;  %v4586_v49 = vpop.f32.mrb[5].mxu0 }
 0x21a   : > { %v5927_v23 = vadd.f32 %v4586_v49, %v1835_v50  ;;  %v5895_v25 = vpop.f32.mrb[6].mxu0  ;;  %4769 = vxpose.xlu0.b32.cont [2/16] (narrow) %v4737_v34, 16 }
 0x21b   : > { %v5928_v1 = vadd.f32 %v5895_v25, %v5725_v54  ;;  %v4589_v7 = vpop.f32.mrb[7].mxu0  ;;  %v4742_v48 = vadd.f32 %v5926_v6, %v8175_v0 }
 0x21c   : > { %v5929_v61 = vadd.f32 %v4589_v7, %v1838_v18  ;;  %v4740_v46 = vadd.f32 %v5927_v23, %v8175_v0 }
 0x21d   : > { %v4743_v56 = vadd.f32 %v5928_v1, %v8175_v0 }
 0x21e   : > { %4770 = vxpose.xlu0.b32.cont [3/16] (narrow) %v4738_v22, 16  ;;  %v4741_v60 = vadd.f32 %v5929_v61, %v8175_v0 }
 0x220   : > { %v5898_v44 = vpop.f32.mrb[8].mxu0 }
 0x221   : > { %v5930_v51 = vadd.f32 %v5898_v44, %v5728_v11  ;;  %v4602_v28 = vpop.f32.mrb[9].mxu0 }
 0x222   : > { %v5931_v45 = vadd.f32 %v4602_v28, %v1851_v24  ;;  %v5899_v27 = vpop.f32.mrb[10].mxu0  ;;  %4771 = vxpose.xlu0.b32.cont [4/16] (narrow) %v4739_v3, 16 }
 0x223   : > { %v5932_v53 = vadd.f32 %v5899_v27, %v5729_v32  ;;  %v4605_v21 = vpop.f32.mrb[11].mxu0  ;;  %v4746_v10 = vadd.f32 %v5930_v51, %v8175_v0 }
 0x224   : > { %v5933_v47 = vadd.f32 %v4605_v21, %v1854_v19  ;;  %v4744_v58 = vadd.f32 %v5931_v45, %v8175_v0 }
 0x225   : > { %v4747_v26 = vadd.f32 %v5932_v53, %v8175_v0 }
 0x226   : > { %4772 = vxpose.xlu0.b32.cont [5/16] (narrow) %v4740_v46, 16  ;;  %v4745_v11 = vadd.f32 %v5933_v47, %v8175_v0 }
 0x228   : > { %v5902_v15 = vpop.f32.mrb[12].mxu0 }
 0x229   : > { %v8183_v20 = vadd.f32 %v5902_v15, %v5732_v41  ;;  %v4618_v42 = vpop.f32.mrb[13].mxu0 }
 0x22a   : > { %v5935_v33 = vadd.f32 %v4618_v42, %v1867_v52  ;;  %v5903_v12 = vpop.f32.mrb[14].mxu0  ;;  %4773 = vxpose.xlu0.b32.cont [6/16] (narrow) %v4741_v60, 16 }
 0x22b   : > { %v8185_v31 = vadd.f32 %v5903_v12, %v5733_v2  ;;  %v4621_v57 = vpop.f32.mrb[15].mxu0 }
 0x22c   : > { %v8187_v8 = vadd.f32 %v4621_v57, %v1870_v5  ;;  %v4748_v3 = vadd.f32 %v5935_v33, %v8175_v0 }
 0x22e   : > { %4774 = vxpose.xlu0.b32.cont [7/16] (narrow) %v4742_v48, 16  ;;  %v4749_v46 = vadd.f32 %v8187_v8, %v8175_v0 }
 0x230   : > { %v5906_v62 = vpop.f32.mrb[16].mxu0 }
 0x231   : > { %v5770_v40 = vpop.f32.mrb[16].mxu1  ;;  %v4634_v13 = vpop.f32.mrb[17].mxu0 }
 0x232   : > { %v5938_v17 = vadd.f32 %v5906_v62, %v5770_v40  ;;  %v2609_v30 = vpop.f32.mrb[17].mxu1  ;;  %v5907_v9 = vpop.f32.mrb[18].mxu0  ;;  %4775 = vxpose.xlu0.b32.cont [8/16] (narrow) %v4743_v56, 16 }
 0x233   : > { %v5939_v14 = vadd.f32 %v4634_v13, %v2609_v30  ;;  %v5771_v63 = vpop.f32.mrb[18].mxu1  ;;  %v4637_v4 = vpop.f32.mrb[19].mxu0 }
 0x234   : > { %v5940_v43 = vadd.f32 %v5907_v9, %v5771_v63  ;;  %v2612_v16 = vpop.f32.mrb[19].mxu1  ;;  %v4754_v38 = vadd.f32 %v5938_v17, %v8175_v0  ;;  %v4750_v17 = vadd.f32 %v8183_v20, %v8175_v0 }
 0x235   : > { %v5941_v50 = vadd.f32 %v4637_v4, %v2612_v16  ;;  %v4752_v54 = vadd.f32 %v5939_v14, %v8175_v0 }
 0x236   : > { %4776 = vxpose.xlu0.b32.cont [9/16] (narrow) %v4744_v58, 16  ;;  %v4755_v6 = vadd.f32 %v5940_v43, %v8175_v0  ;;  %v4751_v43 = vadd.f32 %v8185_v31, %v8175_v0 }
 0x237   : > { %4800 = vxpose.xlu1.b32.start [1/16] (narrow) %v4752_v54, 16  ;;  %v4753_v19 = vadd.f32 %v5941_v50, %v8175_v0 }
 0x238   : > { %v5910_v18 = vpop.f32.mrb[20].mxu0 }
 0x239   : > { %v5774_v24 = vpop.f32.mrb[20].mxu1  ;;  %v4650_v32 = vpop.f32.mrb[21].mxu0 }
 0x23a   : > { %v5942_v41 = vadd.f32 %v5910_v18, %v5774_v24  ;;  %v2625_v52 = vpop.f32.mrb[21].mxu1  ;;  %v5911_v2 = vpop.f32.mrb[22].mxu0  ;;  %4777 = vxpose.xlu0.b32.cont [10/16] (narrow) %v4745_v11, 16 }
 0x23b   : > { %v5943_v5 = vadd.f32 %v4650_v32, %v2625_v52  ;;  %4801 = vxpose.xlu1.b32.cont [2/16] (narrow) %v4753_v19, 16  ;;  %v5775_v55 = vpop.f32.mrb[22].mxu1  ;;  %v4653_v29 = vpop.f32.mrb[23].mxu0 }
 0x23c   : > { %v5944_v39 = vadd.f32 %v5911_v2, %v5775_v55  ;;  %v2628_v36 = vpop.f32.mrb[23].mxu1  ;;  %v4758_v9 = vadd.f32 %v5942_v41, %v8175_v0 }
 0x23d   : > { %v5945_v59 = vadd.f32 %v4653_v29, %v2628_v36  ;;  %v4756_v45 = vadd.f32 %v5943_v5, %v8175_v0 }
 0x23e   : > { %4778 = vxpose.xlu0.b32.cont [11/16] (narrow) %v4746_v10, 16  ;;  %v4759_v16 = vadd.f32 %v5944_v39, %v8175_v0 }
 0x23f   : > { %4802 = vxpose.xlu1.b32.cont [3/16] (narrow) %v4754_v38, 16  ;;  %v4757_v42 = vadd.f32 %v5945_v59, %v8175_v0 }
 0x240   : > { %v5914_v37 = vpop.f32.mrb[24].mxu0 }
 0x241   : > { %v5778_v35 = vpop.f32.mrb[24].mxu1  ;;  %v4666_v34 = vpop.f32.mrb[25].mxu0 }
 0x242   : > { %v5946_v49 = vadd.f32 %v5914_v37, %v5778_v35  ;;  %v2641_v23 = vpop.f32.mrb[25].mxu1  ;;  %v5915_v25 = vpop.f32.mrb[26].mxu0  ;;  %4779 = vxpose.xlu0.b32.cont [12/16] (narrow) %v4747_v26, 16 }
 0x243   : > { %v5947_v1 = vadd.f32 %v4666_v34, %v2641_v23  ;;  %4803 = vxpose.xlu1.b32.cont [4/16] (narrow) %v4755_v6, 16  ;;  %v5779_v7 = vpop.f32.mrb[26].mxu1  ;;  %v4669_v61 = vpop.f32.mrb[27].mxu0 }
 0x244   : > { %v5948_v22 = vadd.f32 %v5915_v25, %v5779_v7  ;;  %v2644_v44 = vpop.f32.mrb[27].mxu1  ;;  %v4762_v51 = vadd.f32 %v5946_v49, %v8175_v0 }
 0x245   : > { %v5949_v28 = vadd.f32 %v4669_v61, %v2644_v44  ;;  %v4760_v27 = vadd.f32 %v5947_v1, %v8175_v0 }
 0x246   : > { %4780 = vxpose.xlu0.b32.cont [13/16] (narrow) %v4748_v3, 16  ;;  %v4763_v53 = vadd.f32 %v5948_v22, %v8175_v0 }
 0x247   : > { %4804 = vxpose.xlu1.b32.cont [5/16] (narrow) %v4756_v45, 16  ;;  %v4761_v21 = vadd.f32 %v5949_v28, %v8175_v0 }
 0x248   : > { %v5918_v47 = vpop.f32.mrb[28].mxu0 }
 0x249   : > { %v5782_v15 = vpop.f32.mrb[28].mxu1  ;;  %v4682_v60 = vpop.f32.mrb[29].mxu0 }
 0x24a   : > { %v5950_v33 = vadd.f32 %v5918_v47, %v5782_v15  ;;  %v2657_v12 = vpop.f32.mrb[29].mxu1  ;;  %v5919_v57 = vpop.f32.mrb[30].mxu0  ;;  %4781 = vxpose.xlu0.b32.cont [14/16] (narrow) %v4749_v46, 16 }
 0x24b   : > { %v5951_v48 = vadd.f32 %v4682_v60, %v2657_v12  ;;  %4805 = vxpose.xlu1.b32.cont [6/16] (narrow) %v4757_v42, 16  ;;  %v5783_v62 = vpop.f32.mrb[30].mxu1  ;;  %v4685_v56 = vpop.f32.mrb[31].mxu0 }
 0x24c   : > { %v5952_v40 = vadd.f32 %v5919_v57, %v5783_v62  ;;  %v2660_v13 = vpop.f32.mrb[31].mxu1  ;;  %v4766_v30 = vadd.f32 %v5950_v33, %v8175_v0 }
 0x24d   : > { %v5953_v8 = vadd.f32 %v4685_v56, %v2660_v13  ;;  %v4764_v14 = vadd.f32 %v5951_v48, %v8175_v0 }
 0x24e   : > { %4782 = vxpose.xlu0.b32.cont [15/16] (narrow) %v4750_v17, 16  ;;  %v4767_v63 = vadd.f32 %v5952_v40, %v8175_v0 }
 0x24f   : > { %4806 = vxpose.xlu1.b32.cont [7/16] (narrow) %v4758_v9, 16  ;;  %v4765_v4 = vadd.f32 %v5953_v8, %v8175_v0 }
 0x252   : > { %4783 = vxpose.xlu0.b32.end [16/16] (narrow) %v4751_v43, 16 }
 0x253   : > { %4807 = vxpose.xlu1.b32.cont [8/16] (narrow) %v4759_v16, 16 }
 0x257   : > { %4808 = vxpose.xlu1.b32.cont [9/16] (narrow) %v4760_v27, 16 }
 0x25b   : > { %4809 = vxpose.xlu1.b32.cont [10/16] (narrow) %v4761_v21, 16 }
 0x25f   : > { %4810 = vxpose.xlu1.b32.cont [11/16] (narrow) %v4762_v51, 16 }
 0x263   : > { %4811 = vxpose.xlu1.b32.cont [12/16] (narrow) %v4763_v53, 16 }
 0x267   : > { %4812 = vxpose.xlu1.b32.cont [13/16] (narrow) %v4764_v14, 16 }
 0x26b   : > { %4813 = vxpose.xlu1.b32.cont [14/16] (narrow) %v4765_v4, 16 }
 0x26f   : > { %4814 = vxpose.xlu1.b32.cont [15/16] (narrow) %v4766_v30, 16 }
 0x273   : > { %4815 = vxpose.xlu1.b32.end [16/16] (narrow) %v4767_v63, 16 }
 0x296   : > { %v4784_v20 = vpop.trf.xlu0 }
 0x297   : > { %4832 = vst [vmem:[%s163_s10] sm:$0xff] %v4784_v20 }
 0x29a   : > { %v4785_v31 = vpop.trf.xlu0 }
 0x29b   : > { %4834 = vst [vmem:[%s163_s10 + $0x10] sm:$0xff] %v4785_v31 }
 0x2b7   : > { %v4816_v0 = vpop.trf.xlu1 }
 0x2b8   : > { %4833 = vst [vmem:[%s163_s10 + $0x8] sm:$0xff] %v4816_v0 }
 0x2bb   : > { %v4817_v58 = vpop.trf.xlu1 }
 0x2bc   : > { %4835 = vst [vmem:[%s163_s10 + $0x18] sm:$0xff] %v4817_v58 }
 0x2bd   : > { %6348 = shalt.err (!%p6345_p3)
}
 0x2be   : > { %s6349_s29 = scalar_lea.hbm %s8225_s24, 512  ;;  %s6353_s5 = scalar_lea.hbm %s8271_s3, 1024 }
 0x2bf   : > { %p6350_p4 = scmp.ne.s32.totalorder %s8225_s24, %s6349_s29  ;;  %p6354_p9 = scmp.lt.u32.totalorder %s8225_s24, %s8271_s3 }
 0x2c0   : > { %p6355_p10 = scmp.lt.u32.totalorder %s6353_s5, %s6349_s29  ;;  %p6357_p12 = scmp.lt.u32.totalorder %s6349_s29, %s8225_s24 }
 0x2c1   : > { %p6351_p7 = pnand %p6350_p4, %p6460_p5 }
 0x2c2   : > { %p6356_p11 = por %p6355_p10, %p6354_p9 }
 0x2c3   : > { %p6352_p8 = pneg %p6351_p7 }
 0x2c4   : > { %p6358_p13 = por %p6357_p12, %p6356_p11 }
 0x2c6   : > { %p6359_p0 = pnand %p6358_p13, %p6352_p8 }
 0x2c8   : > { %6362 = shalt.err (!%p6359_p0)
}
 0x2c9   : > { %s6400_s8 = smov 256   ;;  %s6401_s9 = smov 16  }
 0x2ca   : > { %6189 = dma.vmem_to_hbm [thread:$0]  (%p6460_p5), %s8220_s11, 512, %s8225_s24, %s8227_s25, %s6400_s8, %s6400_s8, %s6401_s9  }
 0x2cb PF: > { %p6195_p1 = scmp.ge.s32.totalorder %s6397_s15, 2  ;;  %s4865_s10 = sand.u32 1, %s6385_s12  }
 0x2cc   : > { %s4866_s17 = scalar_lea.sflag [#allocation3], %s4865_s10 }
 0x2cd   : > { %p6192_p2 = pnand %p6195_p1, %p6464_p6 }
 0x2cf   : > { %6380 = dma.done.wait (!%p6192_p2), %s4866_s17, 512  }
 0x2d0   : > { %6382 = vsyncadd (!%p6192_p2), %s4866_s17, 4294966784  ;;  %p13_p3 = scmp.ge.s32.totalorder %s6447_s18, 4   ;;  %s8341_s12 = smov %s6389_s13 }
 0x2d1   : > { %s8342_s13 = smov %s6393_s14  ;;  %s8343_s14 = smov %s6458_s21 }
 0x2d2   : > { %s8344_s15 = smov %s6447_s18  ;;  %15 = sbr.rel (!%p13_p3) target bundleno = 3 (0x3), region = 77 }
 0x2d9   :  { %4871 = vsyncpa [#allocation3], 1 }
 0x2da   :  { %4873 = vsyncpa [#allocation3 + $0x1], 1 }

</bundles_post_ra>
